<compile_context>
chip_gen: v6e
topology: v6e:2x2x1
jax: 0.10.0
libtpu: 0.0.40
codegen_flags: <defaults>
</compile_context>

<pallas_src>
import functools

import jax
import jax.numpy as jnp
from jax import lax
from jax.experimental import pallas as pl
from jax.experimental.pallas import tpu as pltpu


def _esa_kernel(x_ref, p_ref, o_ref, pad_ref, *, H, W, ksize):
    # x_ref  : (1, C, H, W)       VMEM  input block for one batch element
    # p_ref  : (2*k*k + 1,)       SMEM  flat conv weights, bias last
    # o_ref  : (1, 1, H, W)       VMEM  output gate block
    # pad_ref: (2, H+2p, W+2p)    VMEM  zero-padded avg/max maps (f32)
    pad = ksize // 2
    Hp = H + 2 * pad
    Wp = W + 2 * pad

    # ---- zero only the halo; the interior is fully overwritten every step ----
    if pad > 0:
        zrow = jnp.zeros((pad, Wp), jnp.float32)
        zcol = jnp.zeros((H, pad), jnp.float32)
        for ch in range(2):
            pad_ref[ch, 0:pad, :] = zrow
            pad_ref[ch, pad + H:Hp, :] = zrow
            pad_ref[ch, pad:pad + H, 0:pad] = zcol
            pad_ref[ch, pad:pad + H, pad + W:Wp] = zcol

    # ---- channel mean + max as whole-axis reductions (f32 accumulation) ----
    xb = x_ref[0].astype(jnp.float32)                   # (C, H, W)
    avg = jnp.mean(xb, axis=0)                          # (H, W)
    mx = jnp.max(xb, axis=0)                            # (H, W)

    # ---- two whole-map stores into the padded scratch interior ----
    pad_ref[0, pad:pad + H, pad:pad + W] = avg
    pad_ref[1, pad:pad + H, pad:pad + W] = mx

    # ---- 2 x k x k tap accumulation; shifted windows loaded from VMEM ----
    bias = p_ref[2 * ksize * ksize]                     # SMEM scalar
    acc = jnp.full((H, W), bias, dtype=jnp.float32)
    for ch in range(2):
        for ki in range(ksize):
            for kj in range(ksize):
                wgt = p_ref[ch * ksize * ksize + ki * ksize + kj]   # SMEM scalar
                win = pad_ref[ch, ki:ki + H, kj:kj + W]             # VMEM load (vld slot)
                acc = acc + wgt * win

    # Exact sigmoid kept for bit-tight parity with the PyTorch reference.
    o_ref[0, 0, :, :] = jax.nn.sigmoid(acc).astype(o_ref.dtype)


def enhanced_spatial_attention(x, weight, bias):
    """x: (B, C, H, W); weight: (1, 2, k, k); bias: (1,). Returns (B, 1, H, W)."""
    B, C, H, W = x.shape
    ksize = weight.shape[-1]
    assert ksize % 2 == 1, "only odd kernel_size matches PyTorch padding=k//2 semantics"
    pad = ksize // 2

    params = jnp.concatenate(
        [weight.reshape(-1).astype(jnp.float32),
         bias.reshape(-1).astype(jnp.float32)])          # (2*k*k + 1,) -> SMEM

    kernel = functools.partial(_esa_kernel, H=H, W=W, ksize=ksize)

    # Explicit VMEM budget: double-buffered input/output blocks + pad scratch.
    itemsize = jnp.dtype(x.dtype).itemsize
    in_block = C * H * W * itemsize
    out_block = H * W * itemsize
    scratch = 2 * (H + 2 * pad) * (W + 2 * pad) * 4
    vmem_needed = 2 * in_block + 2 * out_block + scratch
    vmem_limit = None
    if vmem_needed > (16 << 20):                         # beyond small-shape defaults
        vmem_limit = min(int(vmem_needed * 2), 100 << 20)

    out = pl.pallas_call(
        kernel,
        out_shape=jax.ShapeDtypeStruct((B, 1, H, W), x.dtype),
        grid_spec=pltpu.PrefetchScalarGridSpec(
            num_scalar_prefetch=0,
            grid=(B,),
            in_specs=[
                pl.BlockSpec((1, C, H, W), lambda b: (b, 0, 0, 0)),
                pl.BlockSpec(memory_space=pltpu.MemorySpace.SMEM),
            ],
            out_specs=pl.BlockSpec((1, 1, H, W), lambda b: (b, 0, 0, 0)),
            scratch_shapes=[
                pltpu.VMEM((2, H + 2 * pad, W + 2 * pad), jnp.float32),
            ],
        ),
        compiler_params=pltpu.CompilerParams(
            dimension_semantics=("parallel",),
            vmem_limit_bytes=vmem_limit),
    )(x, params)

    return out


def enhanced_spatial_attention_ref(x, weight, bias):
    """Pure-JAX reference matching the PyTorch forward exactly."""
    ksize = weight.shape[-1]
    pad = ksize // 2
    avg = jnp.mean(x, axis=1, keepdims=True)
    mx = jnp.max(x, axis=1, keepdims=True)
    combined = jnp.concatenate([avg, mx], axis=1)        # (B, 2, H, W)
    out = lax.conv_general_dilated(
        combined, weight, window_strides=(1, 1),
        padding=((pad, pad), (pad, pad)),
        dimension_numbers=("NCHW", "OIHW", "NCHW"))
    out = out + bias.reshape(1, 1, 1, 1)
    return jax.nn.sigmoid(out)


if __name__ == "__main__":
    key = jax.random.PRNGKey(0)
    kx, kw, kb = jax.random.split(key, 3)

    B, C, H, W = 2, 4, 16, 16
    KSIZE = 7
    x = jax.random.normal(kx, (B, C, H, W), dtype=jnp.float32)
    # Deterministic synthetic Conv2d(2, 1, 7, padding=3) parameters.
    weight = jax.random.normal(kw, (1, 2, KSIZE, KSIZE), dtype=jnp.float32) * 0.1
    bias = jax.random.normal(kb, (1,), dtype=jnp.float32) * 0.1

    out = enhanced_spatial_attention(x, weight, bias)
    out = jax.block_until_ready(out)

    ref = enhanced_spatial_attention_ref(x, weight, bias)
    assert out.shape == (B, 1, H, W)
    assert jnp.allclose(out, ref, atol=2e-5, rtol=1e-5), "mismatch vs reference"

    print("KERNEL_OK")
</pallas_src>

<mosaic_0001>
module attributes {stable_mosaic.version = 11 : i64} {
  func.func @_esa_kernel(%arg0: i32, %arg1: memref<1x4x16x16xf32, #tpu.memory_space<vmem>>, %arg2: memref<99xf32, #tpu.memory_space<smem>>, %arg3: memref<1x1x16x16xf32, #tpu.memory_space<vmem>>, %arg4: memref<2x22x22xf32, #tpu.memory_space<vmem>>) attributes {dimension_semantics = [#tpu.dimension_semantics<parallel>], iteration_bounds = array<i64: 2>, scalar_prefetch = 0 : i64, scratch_operands = 1 : i64, tpu.core_type = #tpu.core_type<tc>, window_params = [{transform_indices = @transform_0, window_bounds = array<i64: 1, 4, 16, 16>}, {transform_indices = @transform_1, window_bounds = array<i64: 99>}, {transform_indices = @transform_2, window_bounds = array<i64: 1, 1, 16, 16>}]} {
    %cst = arith.constant 0.000000e+00 : f32
    %0 = vector.broadcast %cst : f32 to vector<3x22xf32>
    %cst_0 = arith.constant 0.000000e+00 : f32
    %1 = vector.broadcast %cst_0 : f32 to vector<16x3xf32>
    %c0 = arith.constant 0 : index
    %c0_1 = arith.constant 0 : index
    %c0_2 = arith.constant 0 : index
    %2 = vector.load %arg4[%c0, %c0_1, %c0_2] : memref<2x22x22xf32, #tpu.memory_space<vmem>>, vector<1x3x22xf32>
    %3 = vector.shape_cast %2 : vector<1x3x22xf32> to vector<3x22xf32>
    %4 = vector.shape_cast %0 : vector<3x22xf32> to vector<1x3x22xf32>
    tpu.vector_store %arg4[%c0, %c0_1, %c0_2], %4 {strides = array<i32>} : memref<2x22x22xf32, #tpu.memory_space<vmem>>, vector<1x3x22xf32>,
    %c0_3 = arith.constant 0 : index
    %c19 = arith.constant 19 : index
    %c0_4 = arith.constant 0 : index
    %5 = vector.load %arg4[%c0_3, %c19, %c0_4] : memref<2x22x22xf32, #tpu.memory_space<vmem>>, vector<1x3x22xf32>
    %6 = vector.shape_cast %5 : vector<1x3x22xf32> to vector<3x22xf32>
    %7 = vector.shape_cast %0 : vector<3x22xf32> to vector<1x3x22xf32>
    tpu.vector_store %arg4[%c0_3, %c19, %c0_4], %7 {strides = array<i32>} : memref<2x22x22xf32, #tpu.memory_space<vmem>>, vector<1x3x22xf32>,
    %c0_5 = arith.constant 0 : index
    %c3 = arith.constant 3 : index
    %c0_6 = arith.constant 0 : index
    %8 = vector.load %arg4[%c0_5, %c3, %c0_6] : memref<2x22x22xf32, #tpu.memory_space<vmem>>, vector<1x16x3xf32>
    %9 = vector.shape_cast %8 : vector<1x16x3xf32> to vector<16x3xf32>
    %10 = vector.shape_cast %1 : vector<16x3xf32> to vector<1x16x3xf32>
    tpu.vector_store %arg4[%c0_5, %c3, %c0_6], %10 {strides = array<i32>} : memref<2x22x22xf32, #tpu.memory_space<vmem>>, vector<1x16x3xf32>,
    %c0_7 = arith.constant 0 : index
    %c3_8 = arith.constant 3 : index
    %c19_9 = arith.constant 19 : index
    %11 = vector.load %arg4[%c0_7, %c3_8, %c19_9] : memref<2x22x22xf32, #tpu.memory_space<vmem>>, vector<1x16x3xf32>
    %12 = vector.shape_cast %11 : vector<1x16x3xf32> to vector<16x3xf32>
    %13 = vector.shape_cast %1 : vector<16x3xf32> to vector<1x16x3xf32>
    tpu.vector_store %arg4[%c0_7, %c3_8, %c19_9], %13 {strides = array<i32>} : memref<2x22x22xf32, #tpu.memory_space<vmem>>, vector<1x16x3xf32>,
    %c1 = arith.constant 1 : index
    %c0_10 = arith.constant 0 : index
    %c0_11 = arith.constant 0 : index
    %14 = vector.load %arg4[%c1, %c0_10, %c0_11] : memref<2x22x22xf32, #tpu.memory_space<vmem>>, vector<1x3x22xf32>
    %15 = vector.shape_cast %14 : vector<1x3x22xf32> to vector<3x22xf32>
    %16 = vector.shape_cast %0 : vector<3x22xf32> to vector<1x3x22xf32>
    tpu.vector_store %arg4[%c1, %c0_10, %c0_11], %16 {strides = array<i32>} : memref<2x22x22xf32, #tpu.memory_space<vmem>>, vector<1x3x22xf32>,
    %c1_12 = arith.constant 1 : index
    %c19_13 = arith.constant 19 : index
    %c0_14 = arith.constant 0 : index
    %17 = vector.load %arg4[%c1_12, %c19_13, %c0_14] : memref<2x22x22xf32, #tpu.memory_space<vmem>>, vector<1x3x22xf32>
    %18 = vector.shape_cast %17 : vector<1x3x22xf32> to vector<3x22xf32>
    %19 = vector.shape_cast %0 : vector<3x22xf32> to vector<1x3x22xf32>
    tpu.vector_store %arg4[%c1_12, %c19_13, %c0_14], %19 {strides = array<i32>} : memref<2x22x22xf32, #tpu.memory_space<vmem>>, vector<1x3x22xf32>,
    %c1_15 = arith.constant 1 : index
    %c3_16 = arith.constant 3 : index
    %c0_17 = arith.constant 0 : index
    %20 = vector.load %arg4[%c1_15, %c3_16, %c0_17] : memref<2x22x22xf32, #tpu.memory_space<vmem>>, vector<1x16x3xf32>
    %21 = vector.shape_cast %20 : vector<1x16x3xf32> to vector<16x3xf32>
    %22 = vector.shape_cast %1 : vector<16x3xf32> to vector<1x16x3xf32>
    tpu.vector_store %arg4[%c1_15, %c3_16, %c0_17], %22 {strides = array<i32>} : memref<2x22x22xf32, #tpu.memory_space<vmem>>, vector<1x16x3xf32>,
    %c1_18 = arith.constant 1 : index
    %c3_19 = arith.constant 3 : index
    %c19_20 = arith.constant 19 : index
    %23 = vector.load %arg4[%c1_18, %c3_19, %c19_20] : memref<2x22x22xf32, #tpu.memory_space<vmem>>, vector<1x16x3xf32>
    %24 = vector.shape_cast %23 : vector<1x16x3xf32> to vector<16x3xf32>
    %25 = vector.shape_cast %1 : vector<16x3xf32> to vector<1x16x3xf32>
    tpu.vector_store %arg4[%c1_18, %c3_19, %c19_20], %25 {strides = array<i32>} : memref<2x22x22xf32, #tpu.memory_space<vmem>>, vector<1x16x3xf32>,
    %c0_21 = arith.constant 0 : index
    %c0_22 = arith.constant 0 : index
    %c0_23 = arith.constant 0 : index
    %c0_24 = arith.constant 0 : index
    %26 = vector.load %arg1[%c0_21, %c0_22, %c0_23, %c0_24] : memref<1x4x16x16xf32, #tpu.memory_space<vmem>>, vector<1x4x16x16xf32>
    %27 = vector.shape_cast %26 : vector<1x4x16x16xf32> to vector<4x16x16xf32>
    %cst_25 = arith.constant dense<0.000000e+00> : vector<16x16xf32>
    %28 = vector.multi_reduction <add>, %27, %cst_25 [0] : vector<4x16x16xf32> to vector<16x16xf32>
    %cst_26 = arith.constant 4.000000e+00 : f32
    %29 = vector.broadcast %cst_26 : f32 to vector<16x16xf32>
    %30 = arith.divf %28, %29 : vector<16x16xf32>
    %cst_27 = arith.constant dense<0xFF800000> : vector<16x16xf32>
    %31 = vector.multi_reduction <maximumf>, %27, %cst_27 [0] : vector<4x16x16xf32> to vector<16x16xf32>
    %c0_28 = arith.constant 0 : index
    %c3_29 = arith.constant 3 : index
    %c3_30 = arith.constant 3 : index
    %32 = vector.load %arg4[%c0_28, %c3_29, %c3_30] : memref<2x22x22xf32, #tpu.memory_space<vmem>>, vector<1x16x16xf32>
    %33 = vector.shape_cast %32 : vector<1x16x16xf32> to vector<16x16xf32>
    %34 = vector.shape_cast %30 : vector<16x16xf32> to vector<1x16x16xf32>
    tpu.vector_store %arg4[%c0_28, %c3_29, %c3_30], %34 {strides = array<i32>} : memref<2x22x22xf32, #tpu.memory_space<vmem>>, vector<1x16x16xf32>,
    %c1_31 = arith.constant 1 : index
    %c3_32 = arith.constant 3 : index
    %c3_33 = arith.constant 3 : index
    %35 = vector.load %arg4[%c1_31, %c3_32, %c3_33] : memref<2x22x22xf32, #tpu.memory_space<vmem>>, vector<1x16x16xf32>
    %36 = vector.shape_cast %35 : vector<1x16x16xf32> to vector<16x16xf32>
    %37 = vector.shape_cast %31 : vector<16x16xf32> to vector<1x16x16xf32>
    tpu.vector_store %arg4[%c1_31, %c3_32, %c3_33], %37 {strides = array<i32>} : memref<2x22x22xf32, #tpu.memory_space<vmem>>, vector<1x16x16xf32>,
    %c98 = arith.constant 98 : index
    %38 = memref.load %arg2[%c98] : memref<99xf32, #tpu.memory_space<smem>>
    %39 = vector.broadcast %38 : f32 to vector<16x16xf32>
    %c0_34 = arith.constant 0 : index
    %40 = memref.load %arg2[%c0_34] : memref<99xf32, #tpu.memory_space<smem>>
    %c0_35 = arith.constant 0 : index
    %c0_36 = arith.constant 0 : index
    %c0_37 = arith.constant 0 : index
    %41 = vector.load %arg4[%c0_35, %c0_36, %c0_37] : memref<2x22x22xf32, #tpu.memory_space<vmem>>, vector<1x16x16xf32>
    %42 = vector.shape_cast %41 : vector<1x16x16xf32> to vector<16x16xf32>
    %43 = vector.broadcast %40 : f32 to vector<16x16xf32>
    %44 = arith.mulf %43, %42 : vector<16x16xf32>
    %45 = arith.addf %39, %44 : vector<16x16xf32>
    %c1_38 = arith.constant 1 : index
    %46 = memref.load %arg2[%c1_38] : memref<99xf32, #tpu.memory_space<smem>>
    %c0_39 = arith.constant 0 : index
    %c0_40 = arith.constant 0 : index
    %c1_41 = arith.constant 1 : index
    %47 = vector.load %arg4[%c0_39, %c0_40, %c1_41] : memref<2x22x22xf32, #tpu.memory_space<vmem>>, vector<1x16x16xf32>
    %48 = vector.shape_cast %47 : vector<1x16x16xf32> to vector<16x16xf32>
    %49 = vector.broadcast %46 : f32 to vector<16x16xf32>
    %50 = arith.mulf %49, %48 : vector<16x16xf32>
    %51 = arith.addf %45, %50 : vector<16x16xf32>
    %c2 = arith.constant 2 : index
    %52 = memref.load %arg2[%c2] : memref<99xf32, #tpu.memory_space<smem>>
    %c0_42 = arith.constant 0 : index
    %c0_43 = arith.constant 0 : index
    %c2_44 = arith.constant 2 : index
    %53 = vector.load %arg4[%c0_42, %c0_43, %c2_44] : memref<2x22x22xf32, #tpu.memory_space<vmem>>, vector<1x16x16xf32>
    %54 = vector.shape_cast %53 : vector<1x16x16xf32> to vector<16x16xf32>
    %55 = vector.broadcast %52 : f32 to vector<16x16xf32>
    %56 = arith.mulf %55, %54 : vector<16x16xf32>
    %57 = arith.addf %51, %56 : vector<16x16xf32>
    %c3_45 = arith.constant 3 : index
    %58 = memref.load %arg2[%c3_45] : memref<99xf32, #tpu.memory_space<smem>>
    %c0_46 = arith.constant 0 : index
    %c0_47 = arith.constant 0 : index
    %c3_48 = arith.constant 3 : index
    %59 = vector.load %arg4[%c0_46, %c0_47, %c3_48] : memref<2x22x22xf32, #tpu.memory_space<vmem>>, vector<1x16x16xf32>
    %60 = vector.shape_cast %59 : vector<1x16x16xf32> to vector<16x16xf32>
    %61 = vector.broadcast %58 : f32 to vector<16x16xf32>
    %62 = arith.mulf %61, %60 : vector<16x16xf32>
    %63 = arith.addf %57, %62 : vector<16x16xf32>
    %c4 = arith.constant 4 : index
    %64 = memref.load %arg2[%c4] : memref<99xf32, #tpu.memory_space<smem>>
    %c0_49 = arith.constant 0 : index
    %c0_50 = arith.constant 0 : index
    %c4_51 = arith.constant 4 : index
    %65 = vector.load %arg4[%c0_49, %c0_50, %c4_51] : memref<2x22x22xf32, #tpu.memory_space<vmem>>, vector<1x16x16xf32>
    %66 = vector.shape_cast %65 : vector<1x16x16xf32> to vector<16x16xf32>
    %67 = vector.broadcast %64 : f32 to vector<16x16xf32>
    %68 = arith.mulf %67, %66 : vector<16x16xf32>
    %69 = arith.addf %63, %68 : vector<16x16xf32>
    %c5 = arith.constant 5 : index
    %70 = memref.load %arg2[%c5] : memref<99xf32, #tpu.memory_space<smem>>
    %c0_52 = arith.constant 0 : index
    %c0_53 = arith.constant 0 : index
    %c5_54 = arith.constant 5 : index
    %71 = vector.load %arg4[%c0_52, %c0_53, %c5_54] : memref<2x22x22xf32, #tpu.memory_space<vmem>>, vector<1x16x16xf32>
    %72 = vector.shape_cast %71 : vector<1x16x16xf32> to vector<16x16xf32>
    %73 = vector.broadcast %70 : f32 to vector<16x16xf32>
    %74 = arith.mulf %73, %72 : vector<16x16xf32>
    %75 = arith.addf %69, %74 : vector<16x16xf32>
    %c6 = arith.constant 6 : index
    %76 = memref.load %arg2[%c6] : memref<99xf32, #tpu.memory_space<smem>>
    %c0_55 = arith.constant 0 : index
    %c0_56 = arith.constant 0 : index
    %c6_57 = arith.constant 6 : index
    %77 = vector.load %arg4[%c0_55, %c0_56, %c6_57] : memref<2x22x22xf32, #tpu.memory_space<vmem>>, vector<1x16x16xf32>
    %78 = vector.shape_cast %77 : vector<1x16x16xf32> to vector<16x16xf32>
    %79 = vector.broadcast %76 : f32 to vector<16x16xf32>
    %80 = arith.mulf %79, %78 : vector<16x16xf32>
    %81 = arith.addf %75, %80 : vector<16x16xf32>
    %c7 = arith.constant 7 : index
    %82 = memref.load %arg2[%c7] : memref<99xf32, #tpu.memory_space<smem>>
    %c0_58 = arith.constant 0 : index
    %c1_59 = arith.constant 1 : index
    %c0_60 = arith.constant 0 : index
    %83 = vector.load %arg4[%c0_58, %c1_59, %c0_60] : memref<2x22x22xf32, #tpu.memory_space<vmem>>, vector<1x16x16xf32>
    %84 = vector.shape_cast %83 : vector<1x16x16xf32> to vector<16x16xf32>
    %85 = vector.broadcast %82 : f32 to vector<16x16xf32>
    %86 = arith.mulf %85, %84 : vector<16x16xf32>
    %87 = arith.addf %81, %86 : vector<16x16xf32>
    %c8 = arith.constant 8 : index
    %88 = memref.load %arg2[%c8] : memref<99xf32, #tpu.memory_space<smem>>
    %c0_61 = arith.constant 0 : index
    %c1_62 = arith.constant 1 : index
    %c1_63 = arith.constant 1 : index
    %89 = vector.load %arg4[%c0_61, %c1_62, %c1_63] : memref<2x22x22xf32, #tpu.memory_space<vmem>>, vector<1x16x16xf32>
    %90 = vector.shape_cast %89 : vector<1x16x16xf32> to vector<16x16xf32>
    %91 = vector.broadcast %88 : f32 to vector<16x16xf32>
    %92 = arith.mulf %91, %90 : vector<16x16xf32>
    %93 = arith.addf %87, %92 : vector<16x16xf32>
    %c9 = arith.constant 9 : index
    %94 = memref.load %arg2[%c9] : memref<99xf32, #tpu.memory_space<smem>>
    %c0_64 = arith.constant 0 : index
    %c1_65 = arith.constant 1 : index
    %c2_66 = arith.constant 2 : index
    %95 = vector.load %arg4[%c0_64, %c1_65, %c2_66] : memref<2x22x22xf32, #tpu.memory_space<vmem>>, vector<1x16x16xf32>
    %96 = vector.shape_cast %95 : vector<1x16x16xf32> to vector<16x16xf32>
    %97 = vector.broadcast %94 : f32 to vector<16x16xf32>
    %98 = arith.mulf %97, %96 : vector<16x16xf32>
    %99 = arith.addf %93, %98 : vector<16x16xf32>
    %c10 = arith.constant 10 : index
    %100 = memref.load %arg2[%c10] : memref<99xf32, #tpu.memory_space<smem>>
    %c0_67 = arith.constant 0 : index
    %c1_68 = arith.constant 1 : index
    %c3_69 = arith.constant 3 : index
    %101 = vector.load %arg4[%c0_67, %c1_68, %c3_69] : memref<2x22x22xf32, #tpu.memory_space<vmem>>, vector<1x16x16xf32>
    %102 = vector.shape_cast %101 : vector<1x16x16xf32> to vector<16x16xf32>
    %103 = vector.broadcast %100 : f32 to vector<16x16xf32>
    %104 = arith.mulf %103, %102 : vector<16x16xf32>
    %105 = arith.addf %99, %104 : vector<16x16xf32>
    %c11 = arith.constant 11 : index
    %106 = memref.load %arg2[%c11] : memref<99xf32, #tpu.memory_space<smem>>
    %c0_70 = arith.constant 0 : index
    %c1_71 = arith.constant 1 : index
    %c4_72 = arith.constant 4 : index
    %107 = vector.load %arg4[%c0_70, %c1_71, %c4_72] : memref<2x22x22xf32, #tpu.memory_space<vmem>>, vector<1x16x16xf32>
    %108 = vector.shape_cast %107 : vector<1x16x16xf32> to vector<16x16xf32>
    %109 = vector.broadcast %106 : f32 to vector<16x16xf32>
    %110 = arith.mulf %109, %108 : vector<16x16xf32>
    %111 = arith.addf %105, %110 : vector<16x16xf32>
    %c12 = arith.constant 12 : index
    %112 = memref.load %arg2[%c12] : memref<99xf32, #tpu.memory_space<smem>>
    %c0_73 = arith.constant 0 : index
    %c1_74 = arith.constant 1 : index
    %c5_75 = arith.constant 5 : index
    %113 = vector.load %arg4[%c0_73, %c1_74, %c5_75] : memref<2x22x22xf32, #tpu.memory_space<vmem>>, vector<1x16x16xf32>
    %114 = vector.shape_cast %113 : vector<1x16x16xf32> to vector<16x16xf32>
    %115 = vector.broadcast %112 : f32 to vector<16x16xf32>
    %116 = arith.mulf %115, %114 : vector<16x16xf32>
    %117 = arith.addf %111, %116 : vector<16x16xf32>
    %c13 = arith.constant 13 : index
    %118 = memref.load %arg2[%c13] : memref<99xf32, #tpu.memory_space<smem>>
    %c0_76 = arith.constant 0 : index
    %c1_77 = arith.constant 1 : index
    %c6_78 = arith.constant 6 : index
    %119 = vector.load %arg4[%c0_76, %c1_77, %c6_78] : memref<2x22x22xf32, #tpu.memory_space<vmem>>, vector<1x16x16xf32>
    %120 = vector.shape_cast %119 : vector<1x16x16xf32> to vector<16x16xf32>
    %121 = vector.broadcast %118 : f32 to vector<16x16xf32>
    %122 = arith.mulf %121, %120 : vector<16x16xf32>
    %123 = arith.addf %117, %122 : vector<16x16xf32>
    %c14 = arith.constant 14 : index
    %124 = memref.load %arg2[%c14] : memref<99xf32, #tpu.memory_space<smem>>
    %c0_79 = arith.constant 0 : index
    %c2_80 = arith.constant 2 : index
    %c0_81 = arith.constant 0 : index
    %125 = vector.load %arg4[%c0_79, %c2_80, %c0_81] : memref<2x22x22xf32, #tpu.memory_space<vmem>>, vector<1x16x16xf32>
    %126 = vector.shape_cast %125 : vector<1x16x16xf32> to vector<16x16xf32>
    %127 = vector.broadcast %124 : f32 to vector<16x16xf32>
    %128 = arith.mulf %127, %126 : vector<16x16xf32>
    %129 = arith.addf %123, %128 : vector<16x16xf32>
    %c15 = arith.constant 15 : index
    %130 = memref.load %arg2[%c15] : memref<99xf32, #tpu.memory_space<smem>>
    %c0_82 = arith.constant 0 : index
    %c2_83 = arith.constant 2 : index
    %c1_84 = arith.constant 1 : index
    %131 = vector.load %arg4[%c0_82, %c2_83, %c1_84] : memref<2x22x22xf32, #tpu.memory_space<vmem>>, vector<1x16x16xf32>
    %132 = vector.shape_cast %131 : vector<1x16x16xf32> to vector<16x16xf32>
    %133 = vector.broadcast %130 : f32 to vector<16x16xf32>
    %134 = arith.mulf %133, %132 : vector<16x16xf32>
    %135 = arith.addf %129, %134 : vector<16x16xf32>
    %c16 = arith.constant 16 : index
    %136 = memref.load %arg2[%c16] : memref<99xf32, #tpu.memory_space<smem>>
    %c0_85 = arith.constant 0 : index
    %c2_86 = arith.constant 2 : index
    %c2_87 = arith.constant 2 : index
    %137 = vector.load %arg4[%c0_85, %c2_86, %c2_87] : memref<2x22x22xf32, #tpu.memory_space<vmem>>, vector<1x16x16xf32>
    %138 = vector.shape_cast %137 : vector<1x16x16xf32> to vector<16x16xf32>
    %139 = vector.broadcast %136 : f32 to vector<16x16xf32>
    %140 = arith.mulf %139, %138 : vector<16x16xf32>
    %141 = arith.addf %135, %140 : vector<16x16xf32>
    %c17 = arith.constant 17 : index
    %142 = memref.load %arg2[%c17] : memref<99xf32, #tpu.memory_space<smem>>
    %c0_88 = arith.constant 0 : index
    %c2_89 = arith.constant 2 : index
    %c3_90 = arith.constant 3 : index
    %143 = vector.load %arg4[%c0_88, %c2_89, %c3_90] : memref<2x22x22xf32, #tpu.memory_space<vmem>>, vector<1x16x16xf32>
    %144 = vector.shape_cast %143 : vector<1x16x16xf32> to vector<16x16xf32>
    %145 = vector.broadcast %142 : f32 to vector<16x16xf32>
    %146 = arith.mulf %145, %144 : vector<16x16xf32>
    %147 = arith.addf %141, %146 : vector<16x16xf32>
    %c18 = arith.constant 18 : index
    %148 = memref.load %arg2[%c18] : memref<99xf32, #tpu.memory_space<smem>>
    %c0_91 = arith.constant 0 : index
    %c2_92 = arith.constant 2 : index
    %c4_93 = arith.constant 4 : index
    %149 = vector.load %arg4[%c0_91, %c2_92, %c4_93] : memref<2x22x22xf32, #tpu.memory_space<vmem>>, vector<1x16x16xf32>
    %150 = vector.shape_cast %149 : vector<1x16x16xf32> to vector<16x16xf32>
    %151 = vector.broadcast %148 : f32 to vector<16x16xf32>
    %152 = arith.mulf %151, %150 : vector<16x16xf32>
    %153 = arith.addf %147, %152 : vector<16x16xf32>
    %c19_94 = arith.constant 19 : index
    %154 = memref.load %arg2[%c19_94] : memref<99xf32, #tpu.memory_space<smem>>
    %c0_95 = arith.constant 0 : index
    %c2_96 = arith.constant 2 : index
    %c5_97 = arith.constant 5 : index
    %155 = vector.load %arg4[%c0_95, %c2_96, %c5_97] : memref<2x22x22xf32, #tpu.memory_space<vmem>>, vector<1x16x16xf32>
    %156 = vector.shape_cast %155 : vector<1x16x16xf32> to vector<16x16xf32>
    %157 = vector.broadcast %154 : f32 to vector<16x16xf32>
    %158 = arith.mulf %157, %156 : vector<16x16xf32>
    %159 = arith.addf %153, %158 : vector<16x16xf32>
    %c20 = arith.constant 20 : index
    %160 = memref.load %arg2[%c20] : memref<99xf32, #tpu.memory_space<smem>>
    %c0_98 = arith.constant 0 : index
    %c2_99 = arith.constant 2 : index
    %c6_100 = arith.constant 6 : index
    %161 = vector.load %arg4[%c0_98, %c2_99, %c6_100] : memref<2x22x22xf32, #tpu.memory_space<vmem>>, vector<1x16x16xf32>
    %162 = vector.shape_cast %161 : vector<1x16x16xf32> to vector<16x16xf32>
    %163 = vector.broadcast %160 : f32 to vector<16x16xf32>
    %164 = arith.mulf %163, %162 : vector<16x16xf32>
    %165 = arith.addf %159, %164 : vector<16x16xf32>
    %c21 = arith.constant 21 : index
    %166 = memref.load %arg2[%c21] : memref<99xf32, #tpu.memory_space<smem>>
    %c0_101 = arith.constant 0 : index
    %c3_102 = arith.constant 3 : index
    %c0_103 = arith.constant 0 : index
    %167 = vector.load %arg4[%c0_101, %c3_102, %c0_103] : memref<2x22x22xf32, #tpu.memory_space<vmem>>, vector<1x16x16xf32>
    %168 = vector.shape_cast %167 : vector<1x16x16xf32> to vector<16x16xf32>
    %169 = vector.broadcast %166 : f32 to vector<16x16xf32>
    %170 = arith.mulf %169, %168 : vector<16x16xf32>
    %171 = arith.addf %165, %170 : vector<16x16xf32>
    %c22 = arith.constant 22 : index
    %172 = memref.load %arg2[%c22] : memref<99xf32, #tpu.memory_space<smem>>
    %c0_104 = arith.constant 0 : index
    %c3_105 = arith.constant 3 : index
    %c1_106 = arith.constant 1 : index
    %173 = vector.load %arg4[%c0_104, %c3_105, %c1_106] : memref<2x22x22xf32, #tpu.memory_space<vmem>>, vector<1x16x16xf32>
    %174 = vector.shape_cast %173 : vector<1x16x16xf32> to vector<16x16xf32>
    %175 = vector.broadcast %172 : f32 to vector<16x16xf32>
    %176 = arith.mulf %175, %174 : vector<16x16xf32>
    %177 = arith.addf %171, %176 : vector<16x16xf32>
    %c23 = arith.constant 23 : index
    %178 = memref.load %arg2[%c23] : memref<99xf32, #tpu.memory_space<smem>>
    %c0_107 = arith.constant 0 : index
    %c3_108 = arith.constant 3 : index
    %c2_109 = arith.constant 2 : index
    %179 = vector.load %arg4[%c0_107, %c3_108, %c2_109] : memref<2x22x22xf32, #tpu.memory_space<vmem>>, vector<1x16x16xf32>
    %180 = vector.shape_cast %179 : vector<1x16x16xf32> to vector<16x16xf32>
    %181 = vector.broadcast %178 : f32 to vector<16x16xf32>
    %182 = arith.mulf %181, %180 : vector<16x16xf32>
    %183 = arith.addf %177, %182 : vector<16x16xf32>
    %c24 = arith.constant 24 : index
    %184 = memref.load %arg2[%c24] : memref<99xf32, #tpu.memory_space<smem>>
    %c0_110 = arith.constant 0 : index
    %c3_111 = arith.constant 3 : index
    %c3_112 = arith.constant 3 : index
    %185 = vector.load %arg4[%c0_110, %c3_111, %c3_112] : memref<2x22x22xf32, #tpu.memory_space<vmem>>, vector<1x16x16xf32>
    %186 = vector.shape_cast %185 : vector<1x16x16xf32> to vector<16x16xf32>
    %187 = vector.broadcast %184 : f32 to vector<16x16xf32>
    %188 = arith.mulf %187, %186 : vector<16x16xf32>
    %189 = arith.addf %183, %188 : vector<16x16xf32>
    %c25 = arith.constant 25 : index
    %190 = memref.load %arg2[%c25] : memref<99xf32, #tpu.memory_space<smem>>
    %c0_113 = arith.constant 0 : index
    %c3_114 = arith.constant 3 : index
    %c4_115 = arith.constant 4 : index
    %191 = vector.load %arg4[%c0_113, %c3_114, %c4_115] : memref<2x22x22xf32, #tpu.memory_space<vmem>>, vector<1x16x16xf32>
    %192 = vector.shape_cast %191 : vector<1x16x16xf32> to vector<16x16xf32>
    %193 = vector.broadcast %190 : f32 to vector<16x16xf32>
    %194 = arith.mulf %193, %192 : vector<16x16xf32>
    %195 = arith.addf %189, %194 : vector<16x16xf32>
    %c26 = arith.constant 26 : index
    %196 = memref.load %arg2[%c26] : memref<99xf32, #tpu.memory_space<smem>>
    %c0_116 = arith.constant 0 : index
    %c3_117 = arith.constant 3 : index
    %c5_118 = arith.constant 5 : index
    %197 = vector.load %arg4[%c0_116, %c3_117, %c5_118] : memref<2x22x22xf32, #tpu.memory_space<vmem>>, vector<1x16x16xf32>
    %198 = vector.shape_cast %197 : vector<1x16x16xf32> to vector<16x16xf32>
    %199 = vector.broadcast %196 : f32 to vector<16x16xf32>
    %200 = arith.mulf %199, %198 : vector<16x16xf32>
    %201 = arith.addf %195, %200 : vector<16x16xf32>
    %c27 = arith.constant 27 : index
    %202 = memref.load %arg2[%c27] : memref<99xf32, #tpu.memory_space<smem>>
    %c0_119 = arith.constant 0 : index
    %c3_120 = arith.constant 3 : index
    %c6_121 = arith.constant 6 : index
    %203 = vector.load %arg4[%c0_119, %c3_120, %c6_121] : memref<2x22x22xf32, #tpu.memory_space<vmem>>, vector<1x16x16xf32>
    %204 = vector.shape_cast %203 : vector<1x16x16xf32> to vector<16x16xf32>
    %205 = vector.broadcast %202 : f32 to vector<16x16xf32>
    %206 = arith.mulf %205, %204 : vector<16x16xf32>
    %207 = arith.addf %201, %206 : vector<16x16xf32>
    %c28 = arith.constant 28 : index
    %208 = memref.load %arg2[%c28] : memref<99xf32, #tpu.memory_space<smem>>
    %c0_122 = arith.constant 0 : index
    %c4_123 = arith.constant 4 : index
    %c0_124 = arith.constant 0 : index
    %209 = vector.load %arg4[%c0_122, %c4_123, %c0_124] : memref<2x22x22xf32, #tpu.memory_space<vmem>>, vector<1x16x16xf32>
    %210 = vector.shape_cast %209 : vector<1x16x16xf32> to vector<16x16xf32>
    %211 = vector.broadcast %208 : f32 to vector<16x16xf32>
    %212 = arith.mulf %211, %210 : vector<16x16xf32>
    %213 = arith.addf %207, %212 : vector<16x16xf32>
    %c29 = arith.constant 29 : index
    %214 = memref.load %arg2[%c29] : memref<99xf32, #tpu.memory_space<smem>>
    %c0_125 = arith.constant 0 : index
    %c4_126 = arith.constant 4 : index
    %c1_127 = arith.constant 1 : index
    %215 = vector.load %arg4[%c0_125, %c4_126, %c1_127] : memref<2x22x22xf32, #tpu.memory_space<vmem>>, vector<1x16x16xf32>
    %216 = vector.shape_cast %215 : vector<1x16x16xf32> to vector<16x16xf32>
    %217 = vector.broadcast %214 : f32 to vector<16x16xf32>
    %218 = arith.mulf %217, %216 : vector<16x16xf32>
    %219 = arith.addf %213, %218 : vector<16x16xf32>
    %c30 = arith.constant 30 : index
    %220 = memref.load %arg2[%c30] : memref<99xf32, #tpu.memory_space<smem>>
    %c0_128 = arith.constant 0 : index
    %c4_129 = arith.constant 4 : index
    %c2_130 = arith.constant 2 : index
    %221 = vector.load %arg4[%c0_128, %c4_129, %c2_130] : memref<2x22x22xf32, #tpu.memory_space<vmem>>, vector<1x16x16xf32>
    %222 = vector.shape_cast %221 : vector<1x16x16xf32> to vector<16x16xf32>
    %223 = vector.broadcast %220 : f32 to vector<16x16xf32>
    %224 = arith.mulf %223, %222 : vector<16x16xf32>
    %225 = arith.addf %219, %224 : vector<16x16xf32>
    %c31 = arith.constant 31 : index
    %226 = memref.load %arg2[%c31] : memref<99xf32, #tpu.memory_space<smem>>
    %c0_131 = arith.constant 0 : index
    %c4_132 = arith.constant 4 : index
    %c3_133 = arith.constant 3 : index
    %227 = vector.load %arg4[%c0_131, %c4_132, %c3_133] : memref<2x22x22xf32, #tpu.memory_space<vmem>>, vector<1x16x16xf32>
    %228 = vector.shape_cast %227 : vector<1x16x16xf32> to vector<16x16xf32>
    %229 = vector.broadcast %226 : f32 to vector<16x16xf32>
    %230 = arith.mulf %229, %228 : vector<16x16xf32>
    %231 = arith.addf %225, %230 : vector<16x16xf32>
    %c32 = arith.constant 32 : index
    %232 = memref.load %arg2[%c32] : memref<99xf32, #tpu.memory_space<smem>>
    %c0_134 = arith.constant 0 : index
    %c4_135 = arith.constant 4 : index
    %c4_136 = arith.constant 4 : index
    %233 = vector.load %arg4[%c0_134, %c4_135, %c4_136] : memref<2x22x22xf32, #tpu.memory_space<vmem>>, vector<1x16x16xf32>
    %234 = vector.shape_cast %233 : vector<1x16x16xf32> to vector<16x16xf32>
    %235 = vector.broadcast %232 : f32 to vector<16x16xf32>
    %236 = arith.mulf %235, %234 : vector<16x16xf32>
    %237 = arith.addf %231, %236 : vector<16x16xf32>
    %c33 = arith.constant 33 : index
    %238 = memref.load %arg2[%c33] : memref<99xf32, #tpu.memory_space<smem>>
    %c0_137 = arith.constant 0 : index
    %c4_138 = arith.constant 4 : index
    %c5_139 = arith.constant 5 : index
    %239 = vector.load %arg4[%c0_137, %c4_138, %c5_139] : memref<2x22x22xf32, #tpu.memory_space<vmem>>, vector<1x16x16xf32>
    %240 = vector.shape_cast %239 : vector<1x16x16xf32> to vector<16x16xf32>
    %241 = vector.broadcast %238 : f32 to vector<16x16xf32>
    %242 = arith.mulf %241, %240 : vector<16x16xf32>
    %243 = arith.addf %237, %242 : vector<16x16xf32>
    %c34 = arith.constant 34 : index
    %244 = memref.load %arg2[%c34] : memref<99xf32, #tpu.memory_space<smem>>
    %c0_140 = arith.constant 0 : index
    %c4_141 = arith.constant 4 : index
    %c6_142 = arith.constant 6 : index
    %245 = vector.load %arg4[%c0_140, %c4_141, %c6_142] : memref<2x22x22xf32, #tpu.memory_space<vmem>>, vector<1x16x16xf32>
    %246 = vector.shape_cast %245 : vector<1x16x16xf32> to vector<16x16xf32>
    %247 = vector.broadcast %244 : f32 to vector<16x16xf32>
    %248 = arith.mulf %247, %246 : vector<16x16xf32>
    %249 = arith.addf %243, %248 : vector<16x16xf32>
    %c35 = arith.constant 35 : index
    %250 = memref.load %arg2[%c35] : memref<99xf32, #tpu.memory_space<smem>>
    %c0_143 = arith.constant 0 : index
    %c5_144 = arith.constant 5 : index
    %c0_145 = arith.constant 0 : index
    %251 = vector.load %arg4[%c0_143, %c5_144, %c0_145] : memref<2x22x22xf32, #tpu.memory_space<vmem>>, vector<1x16x16xf32>
    %252 = vector.shape_cast %251 : vector<1x16x16xf32> to vector<16x16xf32>
    %253 = vector.broadcast %250 : f32 to vector<16x16xf32>
    %254 = arith.mulf %253, %252 : vector<16x16xf32>
    %255 = arith.addf %249, %254 : vector<16x16xf32>
    %c36 = arith.constant 36 : index
    %256 = memref.load %arg2[%c36] : memref<99xf32, #tpu.memory_space<smem>>
    %c0_146 = arith.constant 0 : index
    %c5_147 = arith.constant 5 : index
    %c1_148 = arith.constant 1 : index
    %257 = vector.load %arg4[%c0_146, %c5_147, %c1_148] : memref<2x22x22xf32, #tpu.memory_space<vmem>>, vector<1x16x16xf32>
    %258 = vector.shape_cast %257 : vector<1x16x16xf32> to vector<16x16xf32>
    %259 = vector.broadcast %256 : f32 to vector<16x16xf32>
    %260 = arith.mulf %259, %258 : vector<16x16xf32>
    %261 = arith.addf %255, %260 : vector<16x16xf32>
    %c37 = arith.constant 37 : index
    %262 = memref.load %arg2[%c37] : memref<99xf32, #tpu.memory_space<smem>>
    %c0_149 = arith.constant 0 : index
    %c5_150 = arith.constant 5 : index
    %c2_151 = arith.constant 2 : index
    %263 = vector.load %arg4[%c0_149, %c5_150, %c2_151] : memref<2x22x22xf32, #tpu.memory_space<vmem>>, vector<1x16x16xf32>
    %264 = vector.shape_cast %263 : vector<1x16x16xf32> to vector<16x16xf32>
    %265 = vector.broadcast %262 : f32 to vector<16x16xf32>
    %266 = arith.mulf %265, %264 : vector<16x16xf32>
    %267 = arith.addf %261, %266 : vector<16x16xf32>
    %c38 = arith.constant 38 : index
    %268 = memref.load %arg2[%c38] : memref<99xf32, #tpu.memory_space<smem>>
    %c0_152 = arith.constant 0 : index
    %c5_153 = arith.constant 5 : index
    %c3_154 = arith.constant 3 : index
    %269 = vector.load %arg4[%c0_152, %c5_153, %c3_154] : memref<2x22x22xf32, #tpu.memory_space<vmem>>, vector<1x16x16xf32>
    %270 = vector.shape_cast %269 : vector<1x16x16xf32> to vector<16x16xf32>
    %271 = vector.broadcast %268 : f32 to vector<16x16xf32>
    %272 = arith.mulf %271, %270 : vector<16x16xf32>
    %273 = arith.addf %267, %272 : vector<16x16xf32>
    %c39 = arith.constant 39 : index
    %274 = memref.load %arg2[%c39] : memref<99xf32, #tpu.memory_space<smem>>
    %c0_155 = arith.constant 0 : index
    %c5_156 = arith.constant 5 : index
    %c4_157 = arith.constant 4 : index
    %275 = vector.load %arg4[%c0_155, %c5_156, %c4_157] : memref<2x22x22xf32, #tpu.memory_space<vmem>>, vector<1x16x16xf32>
    %276 = vector.shape_cast %275 : vector<1x16x16xf32> to vector<16x16xf32>
    %277 = vector.broadcast %274 : f32 to vector<16x16xf32>
    %278 = arith.mulf %277, %276 : vector<16x16xf32>
    %279 = arith.addf %273, %278 : vector<16x16xf32>
    %c40 = arith.constant 40 : index
    %280 = memref.load %arg2[%c40] : memref<99xf32, #tpu.memory_space<smem>>
    %c0_158 = arith.constant 0 : index
    %c5_159 = arith.constant 5 : index
    %c5_160 = arith.constant 5 : index
    %281 = vector.load %arg4[%c0_158, %c5_159, %c5_160] : memref<2x22x22xf32, #tpu.memory_space<vmem>>, vector<1x16x16xf32>
    %282 = vector.shape_cast %281 : vector<1x16x16xf32> to vector<16x16xf32>
    %283 = vector.broadcast %280 : f32 to vector<16x16xf32>
    %284 = arith.mulf %283, %282 : vector<16x16xf32>
    %285 = arith.addf %279, %284 : vector<16x16xf32>
    %c41 = arith.constant 41 : index
    %286 = memref.load %arg2[%c41] : memref<99xf32, #tpu.memory_space<smem>>
    %c0_161 = arith.constant 0 : index
    %c5_162 = arith.constant 5 : index
    %c6_163 = arith.constant 6 : index
    %287 = vector.load %arg4[%c0_161, %c5_162, %c6_163] : memref<2x22x22xf32, #tpu.memory_space<vmem>>, vector<1x16x16xf32>
    %288 = vector.shape_cast %287 : vector<1x16x16xf32> to vector<16x16xf32>
    %289 = vector.broadcast %286 : f32 to vector<16x16xf32>
    %290 = arith.mulf %289, %288 : vector<16x16xf32>
    %291 = arith.addf %285, %290 : vector<16x16xf32>
    %c42 = arith.constant 42 : index
    %292 = memref.load %arg2[%c42] : memref<99xf32, #tpu.memory_space<smem>>
    %c0_164 = arith.constant 0 : index
    %c6_165 = arith.constant 6 : index
    %c0_166 = arith.constant 0 : index
    %293 = vector.load %arg4[%c0_164, %c6_165, %c0_166] : memref<2x22x22xf32, #tpu.memory_space<vmem>>, vector<1x16x16xf32>
    %294 = vector.shape_cast %293 : vector<1x16x16xf32> to vector<16x16xf32>
    %295 = vector.broadcast %292 : f32 to vector<16x16xf32>
    %296 = arith.mulf %295, %294 : vector<16x16xf32>
    %297 = arith.addf %291, %296 : vector<16x16xf32>
    %c43 = arith.constant 43 : index
    %298 = memref.load %arg2[%c43] : memref<99xf32, #tpu.memory_space<smem>>
    %c0_167 = arith.constant 0 : index
    %c6_168 = arith.constant 6 : index
    %c1_169 = arith.constant 1 : index
    %299 = vector.load %arg4[%c0_167, %c6_168, %c1_169] : memref<2x22x22xf32, #tpu.memory_space<vmem>>, vector<1x16x16xf32>
    %300 = vector.shape_cast %299 : vector<1x16x16xf32> to vector<16x16xf32>
    %301 = vector.broadcast %298 : f32 to vector<16x16xf32>
    %302 = arith.mulf %301, %300 : vector<16x16xf32>
    %303 = arith.addf %297, %302 : vector<16x16xf32>
    %c44 = arith.constant 44 : index
    %304 = memref.load %arg2[%c44] : memref<99xf32, #tpu.memory_space<smem>>
    %c0_170 = arith.constant 0 : index
    %c6_171 = arith.constant 6 : index
    %c2_172 = arith.constant 2 : index
    %305 = vector.load %arg4[%c0_170, %c6_171, %c2_172] : memref<2x22x22xf32, #tpu.memory_space<vmem>>, vector<1x16x16xf32>
    %306 = vector.shape_cast %305 : vector<1x16x16xf32> to vector<16x16xf32>
    %307 = vector.broadcast %304 : f32 to vector<16x16xf32>
    %308 = arith.mulf %307, %306 : vector<16x16xf32>
    %309 = arith.addf %303, %308 : vector<16x16xf32>
    %c45 = arith.constant 45 : index
    %310 = memref.load %arg2[%c45] : memref<99xf32, #tpu.memory_space<smem>>
    %c0_173 = arith.constant 0 : index
    %c6_174 = arith.constant 6 : index
    %c3_175 = arith.constant 3 : index
    %311 = vector.load %arg4[%c0_173, %c6_174, %c3_175] : memref<2x22x22xf32, #tpu.memory_space<vmem>>, vector<1x16x16xf32>
    %312 = vector.shape_cast %311 : vector<1x16x16xf32> to vector<16x16xf32>
    %313 = vector.broadcast %310 : f32 to vector<16x16xf32>
    %314 = arith.mulf %313, %312 : vector<16x16xf32>
    %315 = arith.addf %309, %314 : vector<16x16xf32>
    %c46 = arith.constant 46 : index
    %316 = memref.load %arg2[%c46] : memref<99xf32, #tpu.memory_space<smem>>
    %c0_176 = arith.constant 0 : index
    %c6_177 = arith.constant 6 : index
    %c4_178 = arith.constant 4 : index
    %317 = vector.load %arg4[%c0_176, %c6_177, %c4_178] : memref<2x22x22xf32, #tpu.memory_space<vmem>>, vector<1x16x16xf32>
    %318 = vector.shape_cast %317 : vector<1x16x16xf32> to vector<16x16xf32>
    %319 = vector.broadcast %316 : f32 to vector<16x16xf32>
    %320 = arith.mulf %319, %318 : vector<16x16xf32>
    %321 = arith.addf %315, %320 : vector<16x16xf32>
    %c47 = arith.constant 47 : index
    %322 = memref.load %arg2[%c47] : memref<99xf32, #tpu.memory_space<smem>>
    %c0_179 = arith.constant 0 : index
    %c6_180 = arith.constant 6 : index
    %c5_181 = arith.constant 5 : index
    %323 = vector.load %arg4[%c0_179, %c6_180, %c5_181] : memref<2x22x22xf32, #tpu.memory_space<vmem>>, vector<1x16x16xf32>
    %324 = vector.shape_cast %323 : vector<1x16x16xf32> to vector<16x16xf32>
    %325 = vector.broadcast %322 : f32 to vector<16x16xf32>
    %326 = arith.mulf %325, %324 : vector<16x16xf32>
    %327 = arith.addf %321, %326 : vector<16x16xf32>
    %c48 = arith.constant 48 : index
    %328 = memref.load %arg2[%c48] : memref<99xf32, #tpu.memory_space<smem>>
    %c0_182 = arith.constant 0 : index
    %c6_183 = arith.constant 6 : index
    %c6_184 = arith.constant 6 : index
    %329 = vector.load %arg4[%c0_182, %c6_183, %c6_184] : memref<2x22x22xf32, #tpu.memory_space<vmem>>, vector<1x16x16xf32>
    %330 = vector.shape_cast %329 : vector<1x16x16xf32> to vector<16x16xf32>
    %331 = vector.broadcast %328 : f32 to vector<16x16xf32>
    %332 = arith.mulf %331, %330 : vector<16x16xf32>
    %333 = arith.addf %327, %332 : vector<16x16xf32>
    %c49 = arith.constant 49 : index
    %334 = memref.load %arg2[%c49] : memref<99xf32, #tpu.memory_space<smem>>
    %c1_185 = arith.constant 1 : index
    %c0_186 = arith.constant 0 : index
    %c0_187 = arith.constant 0 : index
    %335 = vector.load %arg4[%c1_185, %c0_186, %c0_187] : memref<2x22x22xf32, #tpu.memory_space<vmem>>, vector<1x16x16xf32>
    %336 = vector.shape_cast %335 : vector<1x16x16xf32> to vector<16x16xf32>
    %337 = vector.broadcast %334 : f32 to vector<16x16xf32>
    %338 = arith.mulf %337, %336 : vector<16x16xf32>
    %339 = arith.addf %333, %338 : vector<16x16xf32>
    %c50 = arith.constant 50 : index
    %340 = memref.load %arg2[%c50] : memref<99xf32, #tpu.memory_space<smem>>
    %c1_188 = arith.constant 1 : index
    %c0_189 = arith.constant 0 : index
    %c1_190 = arith.constant 1 : index
    %341 = vector.load %arg4[%c1_188, %c0_189, %c1_190] : memref<2x22x22xf32, #tpu.memory_space<vmem>>, vector<1x16x16xf32>
    %342 = vector.shape_cast %341 : vector<1x16x16xf32> to vector<16x16xf32>
    %343 = vector.broadcast %340 : f32 to vector<16x16xf32>
    %344 = arith.mulf %343, %342 : vector<16x16xf32>
    %345 = arith.addf %339, %344 : vector<16x16xf32>
    %c51 = arith.constant 51 : index
    %346 = memref.load %arg2[%c51] : memref<99xf32, #tpu.memory_space<smem>>
    %c1_191 = arith.constant 1 : index
    %c0_192 = arith.constant 0 : index
    %c2_193 = arith.constant 2 : index
    %347 = vector.load %arg4[%c1_191, %c0_192, %c2_193] : memref<2x22x22xf32, #tpu.memory_space<vmem>>, vector<1x16x16xf32>
    %348 = vector.shape_cast %347 : vector<1x16x16xf32> to vector<16x16xf32>
    %349 = vector.broadcast %346 : f32 to vector<16x16xf32>
    %350 = arith.mulf %349, %348 : vector<16x16xf32>
    %351 = arith.addf %345, %350 : vector<16x16xf32>
    %c52 = arith.constant 52 : index
    %352 = memref.load %arg2[%c52] : memref<99xf32, #tpu.memory_space<smem>>
    %c1_194 = arith.constant 1 : index
    %c0_195 = arith.constant 0 : index
    %c3_196 = arith.constant 3 : index
    %353 = vector.load %arg4[%c1_194, %c0_195, %c3_196] : memref<2x22x22xf32, #tpu.memory_space<vmem>>, vector<1x16x16xf32>
    %354 = vector.shape_cast %353 : vector<1x16x16xf32> to vector<16x16xf32>
    %355 = vector.broadcast %352 : f32 to vector<16x16xf32>
    %356 = arith.mulf %355, %354 : vector<16x16xf32>
    %357 = arith.addf %351, %356 : vector<16x16xf32>
    %c53 = arith.constant 53 : index
    %358 = memref.load %arg2[%c53] : memref<99xf32, #tpu.memory_space<smem>>
    %c1_197 = arith.constant 1 : index
    %c0_198 = arith.constant 0 : index
    %c4_199 = arith.constant 4 : index
    %359 = vector.load %arg4[%c1_197, %c0_198, %c4_199] : memref<2x22x22xf32, #tpu.memory_space<vmem>>, vector<1x16x16xf32>
    %360 = vector.shape_cast %359 : vector<1x16x16xf32> to vector<16x16xf32>
    %361 = vector.broadcast %358 : f32 to vector<16x16xf32>
    %362 = arith.mulf %361, %360 : vector<16x16xf32>
    %363 = arith.addf %357, %362 : vector<16x16xf32>
    %c54 = arith.constant 54 : index
    %364 = memref.load %arg2[%c54] : memref<99xf32, #tpu.memory_space<smem>>
    %c1_200 = arith.constant 1 : index
    %c0_201 = arith.constant 0 : index
    %c5_202 = arith.constant 5 : index
    %365 = vector.load %arg4[%c1_200, %c0_201, %c5_202] : memref<2x22x22xf32, #tpu.memory_space<vmem>>, vector<1x16x16xf32>
    %366 = vector.shape_cast %365 : vector<1x16x16xf32> to vector<16x16xf32>
    %367 = vector.broadcast %364 : f32 to vector<16x16xf32>
    %368 = arith.mulf %367, %366 : vector<16x16xf32>
    %369 = arith.addf %363, %368 : vector<16x16xf32>
    %c55 = arith.constant 55 : index
    %370 = memref.load %arg2[%c55] : memref<99xf32, #tpu.memory_space<smem>>
    %c1_203 = arith.constant 1 : index
    %c0_204 = arith.constant 0 : index
    %c6_205 = arith.constant 6 : index
    %371 = vector.load %arg4[%c1_203, %c0_204, %c6_205] : memref<2x22x22xf32, #tpu.memory_space<vmem>>, vector<1x16x16xf32>
    %372 = vector.shape_cast %371 : vector<1x16x16xf32> to vector<16x16xf32>
    %373 = vector.broadcast %370 : f32 to vector<16x16xf32>
    %374 = arith.mulf %373, %372 : vector<16x16xf32>
    %375 = arith.addf %369, %374 : vector<16x16xf32>
    %c56 = arith.constant 56 : index
    %376 = memref.load %arg2[%c56] : memref<99xf32, #tpu.memory_space<smem>>
    %c1_206 = arith.constant 1 : index
    %c1_207 = arith.constant 1 : index
    %c0_208 = arith.constant 0 : index
    %377 = vector.load %arg4[%c1_206, %c1_207, %c0_208] : memref<2x22x22xf32, #tpu.memory_space<vmem>>, vector<1x16x16xf32>
    %378 = vector.shape_cast %377 : vector<1x16x16xf32> to vector<16x16xf32>
    %379 = vector.broadcast %376 : f32 to vector<16x16xf32>
    %380 = arith.mulf %379, %378 : vector<16x16xf32>
    %381 = arith.addf %375, %380 : vector<16x16xf32>
    %c57 = arith.constant 57 : index
    %382 = memref.load %arg2[%c57] : memref<99xf32, #tpu.memory_space<smem>>
    %c1_209 = arith.constant 1 : index
    %c1_210 = arith.constant 1 : index
    %c1_211 = arith.constant 1 : index
    %383 = vector.load %arg4[%c1_209, %c1_210, %c1_211] : memref<2x22x22xf32, #tpu.memory_space<vmem>>, vector<1x16x16xf32>
    %384 = vector.shape_cast %383 : vector<1x16x16xf32> to vector<16x16xf32>
    %385 = vector.broadcast %382 : f32 to vector<16x16xf32>
    %386 = arith.mulf %385, %384 : vector<16x16xf32>
    %387 = arith.addf %381, %386 : vector<16x16xf32>
    %c58 = arith.constant 58 : index
    %388 = memref.load %arg2[%c58] : memref<99xf32, #tpu.memory_space<smem>>
    %c1_212 = arith.constant 1 : index
    %c1_213 = arith.constant 1 : index
    %c2_214 = arith.constant 2 : index
    %389 = vector.load %arg4[%c1_212, %c1_213, %c2_214] : memref<2x22x22xf32, #tpu.memory_space<vmem>>, vector<1x16x16xf32>
    %390 = vector.shape_cast %389 : vector<1x16x16xf32> to vector<16x16xf32>
    %391 = vector.broadcast %388 : f32 to vector<16x16xf32>
    %392 = arith.mulf %391, %390 : vector<16x16xf32>
    %393 = arith.addf %387, %392 : vector<16x16xf32>
    %c59 = arith.constant 59 : index
    %394 = memref.load %arg2[%c59] : memref<99xf32, #tpu.memory_space<smem>>
    %c1_215 = arith.constant 1 : index
    %c1_216 = arith.constant 1 : index
    %c3_217 = arith.constant 3 : index
    %395 = vector.load %arg4[%c1_215, %c1_216, %c3_217] : memref<2x22x22xf32, #tpu.memory_space<vmem>>, vector<1x16x16xf32>
    %396 = vector.shape_cast %395 : vector<1x16x16xf32> to vector<16x16xf32>
    %397 = vector.broadcast %394 : f32 to vector<16x16xf32>
    %398 = arith.mulf %397, %396 : vector<16x16xf32>
    %399 = arith.addf %393, %398 : vector<16x16xf32>
    %c60 = arith.constant 60 : index
    %400 = memref.load %arg2[%c60] : memref<99xf32, #tpu.memory_space<smem>>
    %c1_218 = arith.constant 1 : index
    %c1_219 = arith.constant 1 : index
    %c4_220 = arith.constant 4 : index
    %401 = vector.load %arg4[%c1_218, %c1_219, %c4_220] : memref<2x22x22xf32, #tpu.memory_space<vmem>>, vector<1x16x16xf32>
    %402 = vector.shape_cast %401 : vector<1x16x16xf32> to vector<16x16xf32>
    %403 = vector.broadcast %400 : f32 to vector<16x16xf32>
    %404 = arith.mulf %403, %402 : vector<16x16xf32>
    %405 = arith.addf %399, %404 : vector<16x16xf32>
    %c61 = arith.constant 61 : index
    %406 = memref.load %arg2[%c61] : memref<99xf32, #tpu.memory_space<smem>>
    %c1_221 = arith.constant 1 : index
    %c1_222 = arith.constant 1 : index
    %c5_223 = arith.constant 5 : index
    %407 = vector.load %arg4[%c1_221, %c1_222, %c5_223] : memref<2x22x22xf32, #tpu.memory_space<vmem>>, vector<1x16x16xf32>
    %408 = vector.shape_cast %407 : vector<1x16x16xf32> to vector<16x16xf32>
    %409 = vector.broadcast %406 : f32 to vector<16x16xf32>
    %410 = arith.mulf %409, %408 : vector<16x16xf32>
    %411 = arith.addf %405, %410 : vector<16x16xf32>
    %c62 = arith.constant 62 : index
    %412 = memref.load %arg2[%c62] : memref<99xf32, #tpu.memory_space<smem>>
    %c1_224 = arith.constant 1 : index
    %c1_225 = arith.constant 1 : index
    %c6_226 = arith.constant 6 : index
    %413 = vector.load %arg4[%c1_224, %c1_225, %c6_226] : memref<2x22x22xf32, #tpu.memory_space<vmem>>, vector<1x16x16xf32>
    %414 = vector.shape_cast %413 : vector<1x16x16xf32> to vector<16x16xf32>
    %415 = vector.broadcast %412 : f32 to vector<16x16xf32>
    %416 = arith.mulf %415, %414 : vector<16x16xf32>
    %417 = arith.addf %411, %416 : vector<16x16xf32>
    %c63 = arith.constant 63 : index
    %418 = memref.load %arg2[%c63] : memref<99xf32, #tpu.memory_space<smem>>
    %c1_227 = arith.constant 1 : index
    %c2_228 = arith.constant 2 : index
    %c0_229 = arith.constant 0 : index
    %419 = vector.load %arg4[%c1_227, %c2_228, %c0_229] : memref<2x22x22xf32, #tpu.memory_space<vmem>>, vector<1x16x16xf32>
    %420 = vector.shape_cast %419 : vector<1x16x16xf32> to vector<16x16xf32>
    %421 = vector.broadcast %418 : f32 to vector<16x16xf32>
    %422 = arith.mulf %421, %420 : vector<16x16xf32>
    %423 = arith.addf %417, %422 : vector<16x16xf32>
    %c64 = arith.constant 64 : index
    %424 = memref.load %arg2[%c64] : memref<99xf32, #tpu.memory_space<smem>>
    %c1_230 = arith.constant 1 : index
    %c2_231 = arith.constant 2 : index
    %c1_232 = arith.constant 1 : index
    %425 = vector.load %arg4[%c1_230, %c2_231, %c1_232] : memref<2x22x22xf32, #tpu.memory_space<vmem>>, vector<1x16x16xf32>
    %426 = vector.shape_cast %425 : vector<1x16x16xf32> to vector<16x16xf32>
    %427 = vector.broadcast %424 : f32 to vector<16x16xf32>
    %428 = arith.mulf %427, %426 : vector<16x16xf32>
    %429 = arith.addf %423, %428 : vector<16x16xf32>
    %c65 = arith.constant 65 : index
    %430 = memref.load %arg2[%c65] : memref<99xf32, #tpu.memory_space<smem>>
    %c1_233 = arith.constant 1 : index
    %c2_234 = arith.constant 2 : index
    %c2_235 = arith.constant 2 : index
    %431 = vector.load %arg4[%c1_233, %c2_234, %c2_235] : memref<2x22x22xf32, #tpu.memory_space<vmem>>, vector<1x16x16xf32>
    %432 = vector.shape_cast %431 : vector<1x16x16xf32> to vector<16x16xf32>
    %433 = vector.broadcast %430 : f32 to vector<16x16xf32>
    %434 = arith.mulf %433, %432 : vector<16x16xf32>
    %435 = arith.addf %429, %434 : vector<16x16xf32>
    %c66 = arith.constant 66 : index
    %436 = memref.load %arg2[%c66] : memref<99xf32, #tpu.memory_space<smem>>
    %c1_236 = arith.constant 1 : index
    %c2_237 = arith.constant 2 : index
    %c3_238 = arith.constant 3 : index
    %437 = vector.load %arg4[%c1_236, %c2_237, %c3_238] : memref<2x22x22xf32, #tpu.memory_space<vmem>>, vector<1x16x16xf32>
    %438 = vector.shape_cast %437 : vector<1x16x16xf32> to vector<16x16xf32>
    %439 = vector.broadcast %436 : f32 to vector<16x16xf32>
    %440 = arith.mulf %439, %438 : vector<16x16xf32>
    %441 = arith.addf %435, %440 : vector<16x16xf32>
    %c67 = arith.constant 67 : index
    %442 = memref.load %arg2[%c67] : memref<99xf32, #tpu.memory_space<smem>>
    %c1_239 = arith.constant 1 : index
    %c2_240 = arith.constant 2 : index
    %c4_241 = arith.constant 4 : index
    %443 = vector.load %arg4[%c1_239, %c2_240, %c4_241] : memref<2x22x22xf32, #tpu.memory_space<vmem>>, vector<1x16x16xf32>
    %444 = vector.shape_cast %443 : vector<1x16x16xf32> to vector<16x16xf32>
    %445 = vector.broadcast %442 : f32 to vector<16x16xf32>
    %446 = arith.mulf %445, %444 : vector<16x16xf32>
    %447 = arith.addf %441, %446 : vector<16x16xf32>
    %c68 = arith.constant 68 : index
    %448 = memref.load %arg2[%c68] : memref<99xf32, #tpu.memory_space<smem>>
    %c1_242 = arith.constant 1 : index
    %c2_243 = arith.constant 2 : index
    %c5_244 = arith.constant 5 : index
    %449 = vector.load %arg4[%c1_242, %c2_243, %c5_244] : memref<2x22x22xf32, #tpu.memory_space<vmem>>, vector<1x16x16xf32>
    %450 = vector.shape_cast %449 : vector<1x16x16xf32> to vector<16x16xf32>
    %451 = vector.broadcast %448 : f32 to vector<16x16xf32>
    %452 = arith.mulf %451, %450 : vector<16x16xf32>
    %453 = arith.addf %447, %452 : vector<16x16xf32>
    %c69 = arith.constant 69 : index
    %454 = memref.load %arg2[%c69] : memref<99xf32, #tpu.memory_space<smem>>
    %c1_245 = arith.constant 1 : index
    %c2_246 = arith.constant 2 : index
    %c6_247 = arith.constant 6 : index
    %455 = vector.load %arg4[%c1_245, %c2_246, %c6_247] : memref<2x22x22xf32, #tpu.memory_space<vmem>>, vector<1x16x16xf32>
    %456 = vector.shape_cast %455 : vector<1x16x16xf32> to vector<16x16xf32>
    %457 = vector.broadcast %454 : f32 to vector<16x16xf32>
    %458 = arith.mulf %457, %456 : vector<16x16xf32>
    %459 = arith.addf %453, %458 : vector<16x16xf32>
    %c70 = arith.constant 70 : index
    %460 = memref.load %arg2[%c70] : memref<99xf32, #tpu.memory_space<smem>>
    %c1_248 = arith.constant 1 : index
    %c3_249 = arith.constant 3 : index
    %c0_250 = arith.constant 0 : index
    %461 = vector.load %arg4[%c1_248, %c3_249, %c0_250] : memref<2x22x22xf32, #tpu.memory_space<vmem>>, vector<1x16x16xf32>
    %462 = vector.shape_cast %461 : vector<1x16x16xf32> to vector<16x16xf32>
    %463 = vector.broadcast %460 : f32 to vector<16x16xf32>
    %464 = arith.mulf %463, %462 : vector<16x16xf32>
    %465 = arith.addf %459, %464 : vector<16x16xf32>
    %c71 = arith.constant 71 : index
    %466 = memref.load %arg2[%c71] : memref<99xf32, #tpu.memory_space<smem>>
    %c1_251 = arith.constant 1 : index
    %c3_252 = arith.constant 3 : index
    %c1_253 = arith.constant 1 : index
    %467 = vector.load %arg4[%c1_251, %c3_252, %c1_253] : memref<2x22x22xf32, #tpu.memory_space<vmem>>, vector<1x16x16xf32>
    %468 = vector.shape_cast %467 : vector<1x16x16xf32> to vector<16x16xf32>
    %469 = vector.broadcast %466 : f32 to vector<16x16xf32>
    %470 = arith.mulf %469, %468 : vector<16x16xf32>
    %471 = arith.addf %465, %470 : vector<16x16xf32>
    %c72 = arith.constant 72 : index
    %472 = memref.load %arg2[%c72] : memref<99xf32, #tpu.memory_space<smem>>
    %c1_254 = arith.constant 1 : index
    %c3_255 = arith.constant 3 : index
    %c2_256 = arith.constant 2 : index
    %473 = vector.load %arg4[%c1_254, %c3_255, %c2_256] : memref<2x22x22xf32, #tpu.memory_space<vmem>>, vector<1x16x16xf32>
    %474 = vector.shape_cast %473 : vector<1x16x16xf32> to vector<16x16xf32>
    %475 = vector.broadcast %472 : f32 to vector<16x16xf32>
    %476 = arith.mulf %475, %474 : vector<16x16xf32>
    %477 = arith.addf %471, %476 : vector<16x16xf32>
    %c73 = arith.constant 73 : index
    %478 = memref.load %arg2[%c73] : memref<99xf32, #tpu.memory_space<smem>>
    %c1_257 = arith.constant 1 : index
    %c3_258 = arith.constant 3 : index
    %c3_259 = arith.constant 3 : index
    %479 = vector.load %arg4[%c1_257, %c3_258, %c3_259] : memref<2x22x22xf32, #tpu.memory_space<vmem>>, vector<1x16x16xf32>
    %480 = vector.shape_cast %479 : vector<1x16x16xf32> to vector<16x16xf32>
    %481 = vector.broadcast %478 : f32 to vector<16x16xf32>
    %482 = arith.mulf %481, %480 : vector<16x16xf32>
    %483 = arith.addf %477, %482 : vector<16x16xf32>
    %c74 = arith.constant 74 : index
    %484 = memref.load %arg2[%c74] : memref<99xf32, #tpu.memory_space<smem>>
    %c1_260 = arith.constant 1 : index
    %c3_261 = arith.constant 3 : index
    %c4_262 = arith.constant 4 : index
    %485 = vector.load %arg4[%c1_260, %c3_261, %c4_262] : memref<2x22x22xf32, #tpu.memory_space<vmem>>, vector<1x16x16xf32>
    %486 = vector.shape_cast %485 : vector<1x16x16xf32> to vector<16x16xf32>
    %487 = vector.broadcast %484 : f32 to vector<16x16xf32>
    %488 = arith.mulf %487, %486 : vector<16x16xf32>
    %489 = arith.addf %483, %488 : vector<16x16xf32>
    %c75 = arith.constant 75 : index
    %490 = memref.load %arg2[%c75] : memref<99xf32, #tpu.memory_space<smem>>
    %c1_263 = arith.constant 1 : index
    %c3_264 = arith.constant 3 : index
    %c5_265 = arith.constant 5 : index
    %491 = vector.load %arg4[%c1_263, %c3_264, %c5_265] : memref<2x22x22xf32, #tpu.memory_space<vmem>>, vector<1x16x16xf32>
    %492 = vector.shape_cast %491 : vector<1x16x16xf32> to vector<16x16xf32>
    %493 = vector.broadcast %490 : f32 to vector<16x16xf32>
    %494 = arith.mulf %493, %492 : vector<16x16xf32>
    %495 = arith.addf %489, %494 : vector<16x16xf32>
    %c76 = arith.constant 76 : index
    %496 = memref.load %arg2[%c76] : memref<99xf32, #tpu.memory_space<smem>>
    %c1_266 = arith.constant 1 : index
    %c3_267 = arith.constant 3 : index
    %c6_268 = arith.constant 6 : index
    %497 = vector.load %arg4[%c1_266, %c3_267, %c6_268] : memref<2x22x22xf32, #tpu.memory_space<vmem>>, vector<1x16x16xf32>
    %498 = vector.shape_cast %497 : vector<1x16x16xf32> to vector<16x16xf32>
    %499 = vector.broadcast %496 : f32 to vector<16x16xf32>
    %500 = arith.mulf %499, %498 : vector<16x16xf32>
    %501 = arith.addf %495, %500 : vector<16x16xf32>
    %c77 = arith.constant 77 : index
    %502 = memref.load %arg2[%c77] : memref<99xf32, #tpu.memory_space<smem>>
    %c1_269 = arith.constant 1 : index
    %c4_270 = arith.constant 4 : index
    %c0_271 = arith.constant 0 : index
    %503 = vector.load %arg4[%c1_269, %c4_270, %c0_271] : memref<2x22x22xf32, #tpu.memory_space<vmem>>, vector<1x16x16xf32>
    %504 = vector.shape_cast %503 : vector<1x16x16xf32> to vector<16x16xf32>
    %505 = vector.broadcast %502 : f32 to vector<16x16xf32>
    %506 = arith.mulf %505, %504 : vector<16x16xf32>
    %507 = arith.addf %501, %506 : vector<16x16xf32>
    %c78 = arith.constant 78 : index
    %508 = memref.load %arg2[%c78] : memref<99xf32, #tpu.memory_space<smem>>
    %c1_272 = arith.constant 1 : index
    %c4_273 = arith.constant 4 : index
    %c1_274 = arith.constant 1 : index
    %509 = vector.load %arg4[%c1_272, %c4_273, %c1_274] : memref<2x22x22xf32, #tpu.memory_space<vmem>>, vector<1x16x16xf32>
    %510 = vector.shape_cast %509 : vector<1x16x16xf32> to vector<16x16xf32>
    %511 = vector.broadcast %508 : f32 to vector<16x16xf32>
    %512 = arith.mulf %511, %510 : vector<16x16xf32>
    %513 = arith.addf %507, %512 : vector<16x16xf32>
    %c79 = arith.constant 79 : index
    %514 = memref.load %arg2[%c79] : memref<99xf32, #tpu.memory_space<smem>>
    %c1_275 = arith.constant 1 : index
    %c4_276 = arith.constant 4 : index
    %c2_277 = arith.constant 2 : index
    %515 = vector.load %arg4[%c1_275, %c4_276, %c2_277] : memref<2x22x22xf32, #tpu.memory_space<vmem>>, vector<1x16x16xf32>
    %516 = vector.shape_cast %515 : vector<1x16x16xf32> to vector<16x16xf32>
    %517 = vector.broadcast %514 : f32 to vector<16x16xf32>
    %518 = arith.mulf %517, %516 : vector<16x16xf32>
    %519 = arith.addf %513, %518 : vector<16x16xf32>
    %c80 = arith.constant 80 : index
    %520 = memref.load %arg2[%c80] : memref<99xf32, #tpu.memory_space<smem>>
    %c1_278 = arith.constant 1 : index
    %c4_279 = arith.constant 4 : index
    %c3_280 = arith.constant 3 : index
    %521 = vector.load %arg4[%c1_278, %c4_279, %c3_280] : memref<2x22x22xf32, #tpu.memory_space<vmem>>, vector<1x16x16xf32>
    %522 = vector.shape_cast %521 : vector<1x16x16xf32> to vector<16x16xf32>
    %523 = vector.broadcast %520 : f32 to vector<16x16xf32>
    %524 = arith.mulf %523, %522 : vector<16x16xf32>
    %525 = arith.addf %519, %524 : vector<16x16xf32>
    %c81 = arith.constant 81 : index
    %526 = memref.load %arg2[%c81] : memref<99xf32, #tpu.memory_space<smem>>
    %c1_281 = arith.constant 1 : index
    %c4_282 = arith.constant 4 : index
    %c4_283 = arith.constant 4 : index
    %527 = vector.load %arg4[%c1_281, %c4_282, %c4_283] : memref<2x22x22xf32, #tpu.memory_space<vmem>>, vector<1x16x16xf32>
    %528 = vector.shape_cast %527 : vector<1x16x16xf32> to vector<16x16xf32>
    %529 = vector.broadcast %526 : f32 to vector<16x16xf32>
    %530 = arith.mulf %529, %528 : vector<16x16xf32>
    %531 = arith.addf %525, %530 : vector<16x16xf32>
    %c82 = arith.constant 82 : index
    %532 = memref.load %arg2[%c82] : memref<99xf32, #tpu.memory_space<smem>>
    %c1_284 = arith.constant 1 : index
    %c4_285 = arith.constant 4 : index
    %c5_286 = arith.constant 5 : index
    %533 = vector.load %arg4[%c1_284, %c4_285, %c5_286] : memref<2x22x22xf32, #tpu.memory_space<vmem>>, vector<1x16x16xf32>
    %534 = vector.shape_cast %533 : vector<1x16x16xf32> to vector<16x16xf32>
    %535 = vector.broadcast %532 : f32 to vector<16x16xf32>
    %536 = arith.mulf %535, %534 : vector<16x16xf32>
    %537 = arith.addf %531, %536 : vector<16x16xf32>
    %c83 = arith.constant 83 : index
    %538 = memref.load %arg2[%c83] : memref<99xf32, #tpu.memory_space<smem>>
    %c1_287 = arith.constant 1 : index
    %c4_288 = arith.constant 4 : index
    %c6_289 = arith.constant 6 : index
    %539 = vector.load %arg4[%c1_287, %c4_288, %c6_289] : memref<2x22x22xf32, #tpu.memory_space<vmem>>, vector<1x16x16xf32>
    %540 = vector.shape_cast %539 : vector<1x16x16xf32> to vector<16x16xf32>
    %541 = vector.broadcast %538 : f32 to vector<16x16xf32>
    %542 = arith.mulf %541, %540 : vector<16x16xf32>
    %543 = arith.addf %537, %542 : vector<16x16xf32>
    %c84 = arith.constant 84 : index
    %544 = memref.load %arg2[%c84] : memref<99xf32, #tpu.memory_space<smem>>
    %c1_290 = arith.constant 1 : index
    %c5_291 = arith.constant 5 : index
    %c0_292 = arith.constant 0 : index
    %545 = vector.load %arg4[%c1_290, %c5_291, %c0_292] : memref<2x22x22xf32, #tpu.memory_space<vmem>>, vector<1x16x16xf32>
    %546 = vector.shape_cast %545 : vector<1x16x16xf32> to vector<16x16xf32>
    %547 = vector.broadcast %544 : f32 to vector<16x16xf32>
    %548 = arith.mulf %547, %546 : vector<16x16xf32>
    %549 = arith.addf %543, %548 : vector<16x16xf32>
    %c85 = arith.constant 85 : index
    %550 = memref.load %arg2[%c85] : memref<99xf32, #tpu.memory_space<smem>>
    %c1_293 = arith.constant 1 : index
    %c5_294 = arith.constant 5 : index
    %c1_295 = arith.constant 1 : index
    %551 = vector.load %arg4[%c1_293, %c5_294, %c1_295] : memref<2x22x22xf32, #tpu.memory_space<vmem>>, vector<1x16x16xf32>
    %552 = vector.shape_cast %551 : vector<1x16x16xf32> to vector<16x16xf32>
    %553 = vector.broadcast %550 : f32 to vector<16x16xf32>
    %554 = arith.mulf %553, %552 : vector<16x16xf32>
    %555 = arith.addf %549, %554 : vector<16x16xf32>
    %c86 = arith.constant 86 : index
    %556 = memref.load %arg2[%c86] : memref<99xf32, #tpu.memory_space<smem>>
    %c1_296 = arith.constant 1 : index
    %c5_297 = arith.constant 5 : index
    %c2_298 = arith.constant 2 : index
    %557 = vector.load %arg4[%c1_296, %c5_297, %c2_298] : memref<2x22x22xf32, #tpu.memory_space<vmem>>, vector<1x16x16xf32>
    %558 = vector.shape_cast %557 : vector<1x16x16xf32> to vector<16x16xf32>
    %559 = vector.broadcast %556 : f32 to vector<16x16xf32>
    %560 = arith.mulf %559, %558 : vector<16x16xf32>
    %561 = arith.addf %555, %560 : vector<16x16xf32>
    %c87 = arith.constant 87 : index
    %562 = memref.load %arg2[%c87] : memref<99xf32, #tpu.memory_space<smem>>
    %c1_299 = arith.constant 1 : index
    %c5_300 = arith.constant 5 : index
    %c3_301 = arith.constant 3 : index
    %563 = vector.load %arg4[%c1_299, %c5_300, %c3_301] : memref<2x22x22xf32, #tpu.memory_space<vmem>>, vector<1x16x16xf32>
    %564 = vector.shape_cast %563 : vector<1x16x16xf32> to vector<16x16xf32>
    %565 = vector.broadcast %562 : f32 to vector<16x16xf32>
    %566 = arith.mulf %565, %564 : vector<16x16xf32>
    %567 = arith.addf %561, %566 : vector<16x16xf32>
    %c88 = arith.constant 88 : index
    %568 = memref.load %arg2[%c88] : memref<99xf32, #tpu.memory_space<smem>>
    %c1_302 = arith.constant 1 : index
    %c5_303 = arith.constant 5 : index
    %c4_304 = arith.constant 4 : index
    %569 = vector.load %arg4[%c1_302, %c5_303, %c4_304] : memref<2x22x22xf32, #tpu.memory_space<vmem>>, vector<1x16x16xf32>
    %570 = vector.shape_cast %569 : vector<1x16x16xf32> to vector<16x16xf32>
    %571 = vector.broadcast %568 : f32 to vector<16x16xf32>
    %572 = arith.mulf %571, %570 : vector<16x16xf32>
    %573 = arith.addf %567, %572 : vector<16x16xf32>
    %c89 = arith.constant 89 : index
    %574 = memref.load %arg2[%c89] : memref<99xf32, #tpu.memory_space<smem>>
    %c1_305 = arith.constant 1 : index
    %c5_306 = arith.constant 5 : index
    %c5_307 = arith.constant 5 : index
    %575 = vector.load %arg4[%c1_305, %c5_306, %c5_307] : memref<2x22x22xf32, #tpu.memory_space<vmem>>, vector<1x16x16xf32>
    %576 = vector.shape_cast %575 : vector<1x16x16xf32> to vector<16x16xf32>
    %577 = vector.broadcast %574 : f32 to vector<16x16xf32>
    %578 = arith.mulf %577, %576 : vector<16x16xf32>
    %579 = arith.addf %573, %578 : vector<16x16xf32>
    %c90 = arith.constant 90 : index
    %580 = memref.load %arg2[%c90] : memref<99xf32, #tpu.memory_space<smem>>
    %c1_308 = arith.constant 1 : index
    %c5_309 = arith.constant 5 : index
    %c6_310 = arith.constant 6 : index
    %581 = vector.load %arg4[%c1_308, %c5_309, %c6_310] : memref<2x22x22xf32, #tpu.memory_space<vmem>>, vector<1x16x16xf32>
    %582 = vector.shape_cast %581 : vector<1x16x16xf32> to vector<16x16xf32>
    %583 = vector.broadcast %580 : f32 to vector<16x16xf32>
    %584 = arith.mulf %583, %582 : vector<16x16xf32>
    %585 = arith.addf %579, %584 : vector<16x16xf32>
    %c91 = arith.constant 91 : index
    %586 = memref.load %arg2[%c91] : memref<99xf32, #tpu.memory_space<smem>>
    %c1_311 = arith.constant 1 : index
    %c6_312 = arith.constant 6 : index
    %c0_313 = arith.constant 0 : index
    %587 = vector.load %arg4[%c1_311, %c6_312, %c0_313] : memref<2x22x22xf32, #tpu.memory_space<vmem>>, vector<1x16x16xf32>
    %588 = vector.shape_cast %587 : vector<1x16x16xf32> to vector<16x16xf32>
    %589 = vector.broadcast %586 : f32 to vector<16x16xf32>
    %590 = arith.mulf %589, %588 : vector<16x16xf32>
    %591 = arith.addf %585, %590 : vector<16x16xf32>
    %c92 = arith.constant 92 : index
    %592 = memref.load %arg2[%c92] : memref<99xf32, #tpu.memory_space<smem>>
    %c1_314 = arith.constant 1 : index
    %c6_315 = arith.constant 6 : index
    %c1_316 = arith.constant 1 : index
    %593 = vector.load %arg4[%c1_314, %c6_315, %c1_316] : memref<2x22x22xf32, #tpu.memory_space<vmem>>, vector<1x16x16xf32>
    %594 = vector.shape_cast %593 : vector<1x16x16xf32> to vector<16x16xf32>
    %595 = vector.broadcast %592 : f32 to vector<16x16xf32>
    %596 = arith.mulf %595, %594 : vector<16x16xf32>
    %597 = arith.addf %591, %596 : vector<16x16xf32>
    %c93 = arith.constant 93 : index
    %598 = memref.load %arg2[%c93] : memref<99xf32, #tpu.memory_space<smem>>
    %c1_317 = arith.constant 1 : index
    %c6_318 = arith.constant 6 : index
    %c2_319 = arith.constant 2 : index
    %599 = vector.load %arg4[%c1_317, %c6_318, %c2_319] : memref<2x22x22xf32, #tpu.memory_space<vmem>>, vector<1x16x16xf32>
    %600 = vector.shape_cast %599 : vector<1x16x16xf32> to vector<16x16xf32>
    %601 = vector.broadcast %598 : f32 to vector<16x16xf32>
    %602 = arith.mulf %601, %600 : vector<16x16xf32>
    %603 = arith.addf %597, %602 : vector<16x16xf32>
    %c94 = arith.constant 94 : index
    %604 = memref.load %arg2[%c94] : memref<99xf32, #tpu.memory_space<smem>>
    %c1_320 = arith.constant 1 : index
    %c6_321 = arith.constant 6 : index
    %c3_322 = arith.constant 3 : index
    %605 = vector.load %arg4[%c1_320, %c6_321, %c3_322] : memref<2x22x22xf32, #tpu.memory_space<vmem>>, vector<1x16x16xf32>
    %606 = vector.shape_cast %605 : vector<1x16x16xf32> to vector<16x16xf32>
    %607 = vector.broadcast %604 : f32 to vector<16x16xf32>
    %608 = arith.mulf %607, %606 : vector<16x16xf32>
    %609 = arith.addf %603, %608 : vector<16x16xf32>
    %c95 = arith.constant 95 : index
    %610 = memref.load %arg2[%c95] : memref<99xf32, #tpu.memory_space<smem>>
    %c1_323 = arith.constant 1 : index
    %c6_324 = arith.constant 6 : index
    %c4_325 = arith.constant 4 : index
    %611 = vector.load %arg4[%c1_323, %c6_324, %c4_325] : memref<2x22x22xf32, #tpu.memory_space<vmem>>, vector<1x16x16xf32>
    %612 = vector.shape_cast %611 : vector<1x16x16xf32> to vector<16x16xf32>
    %613 = vector.broadcast %610 : f32 to vector<16x16xf32>
    %614 = arith.mulf %613, %612 : vector<16x16xf32>
    %615 = arith.addf %609, %614 : vector<16x16xf32>
    %c96 = arith.constant 96 : index
    %616 = memref.load %arg2[%c96] : memref<99xf32, #tpu.memory_space<smem>>
    %c1_326 = arith.constant 1 : index
    %c6_327 = arith.constant 6 : index
    %c5_328 = arith.constant 5 : index
    %617 = vector.load %arg4[%c1_326, %c6_327, %c5_328] : memref<2x22x22xf32, #tpu.memory_space<vmem>>, vector<1x16x16xf32>
    %618 = vector.shape_cast %617 : vector<1x16x16xf32> to vector<16x16xf32>
    %619 = vector.broadcast %616 : f32 to vector<16x16xf32>
    %620 = arith.mulf %619, %618 : vector<16x16xf32>
    %621 = arith.addf %615, %620 : vector<16x16xf32>
    %c97 = arith.constant 97 : index
    %622 = memref.load %arg2[%c97] : memref<99xf32, #tpu.memory_space<smem>>
    %c1_329 = arith.constant 1 : index
    %c6_330 = arith.constant 6 : index
    %c6_331 = arith.constant 6 : index
    %623 = vector.load %arg4[%c1_329, %c6_330, %c6_331] : memref<2x22x22xf32, #tpu.memory_space<vmem>>, vector<1x16x16xf32>
    %624 = vector.shape_cast %623 : vector<1x16x16xf32> to vector<16x16xf32>
    %625 = vector.broadcast %622 : f32 to vector<16x16xf32>
    %626 = arith.mulf %625, %624 : vector<16x16xf32>
    %627 = arith.addf %621, %626 : vector<16x16xf32>
    %628 = arith.negf %627 : vector<16x16xf32>
    %629 = math.exp %628 : vector<16x16xf32>
    %cst_332 = arith.constant 1.000000e+00 : f32
    %630 = vector.broadcast %cst_332 : f32 to vector<16x16xf32>
    %631 = arith.addf %630, %629 : vector<16x16xf32>
    %632 = arith.divf %630, %631 : vector<16x16xf32>
    %c0_333 = arith.constant 0 : index
    %c0_334 = arith.constant 0 : index
    %c0_335 = arith.constant 0 : index
    %c0_336 = arith.constant 0 : index
    %633 = vector.load %arg3[%c0_333, %c0_334, %c0_335, %c0_336] : memref<1x1x16x16xf32, #tpu.memory_space<vmem>>, vector<1x1x16x16xf32>
    %634 = vector.shape_cast %633 : vector<1x1x16x16xf32> to vector<16x16xf32>
    %635 = vector.shape_cast %632 : vector<16x16xf32> to vector<1x1x16x16xf32>
    tpu.vector_store %arg3[%c0_333, %c0_334, %c0_335, %c0_336], %635 {strides = array<i32>} : memref<1x1x16x16xf32, #tpu.memory_space<vmem>>, vector<1x1x16x16xf32>,
    return
  }
  func.func @transform_0(%arg0: i32) -> (i32, i32, i32, i32) {
    %c0_i32 = arith.constant 0 : i32
    %c0_i32_0 = arith.constant 0 : i32
    %c0_i32_1 = arith.constant 0 : i32
    %c0_i32_2 = arith.constant 0 : i32
    return %arg0, %c0_i32, %c0_i32_0, %c0_i32_1 : i32, i32, i32, i32
  }
  func.func @transform_1(%arg0: i32) -> i32 {
    %c0_i32 = arith.constant 0 : i32
    %c0_i32_0 = arith.constant 0 : i32
    return %c0_i32 : i32
  }
  func.func @transform_2(%arg0: i32) -> (i32, i32, i32, i32) {
    %c0_i32 = arith.constant 0 : i32
    %c0_i32_0 = arith.constant 0 : i32
    %c0_i32_1 = arith.constant 0 : i32
    %c0_i32_2 = arith.constant 0 : i32
    return %arg0, %c0_i32, %c0_i32_0, %c0_i32_1 : i32, i32, i32, i32
  }
}

</mosaic_0001>

<bundles_post_ra>
// kernel: tpu_custom_call.1
= control target key start
LH: loop header
LB: loop body
LE: loop exit
PB: predicated region body
PF: predicated region fallthrough
CT: control target
= control target key end

     0   :  { %7 = vsyncpa [#allocation4], 0  ;;  %s2813_s0 = inlined_call_operand.hbm [shape: f32[2,4,16,16], index: 0, kind: input, shape index: {}]   ;;  %s2814_s1 = inlined_call_operand.vmem [shape: f32[99], index: 1, kind: input, shape index: {}]   ;;  %s2815_s2 = inlined_call_operand.hbm [shape: f32[2,1,16,16], index: 2, kind: output, shape index: {}]  }
   0x1   :  { %9 = vsyncpa [#allocation4 + $0x1], 0 }
   0x2   :  { %10 = vsyncpa [#allocation6], 0 }
   0x3   :  { %11 = vsyncpa [#allocation5], 0 }
   0x4   :  { %13 = vsyncpa [#allocation5 + $0x1], 0  ;;  %s1994_s9 = smov 0   ;;  %s1996_s10 = smov 0  }
   0x5   :  { %s1998_s11 = smov 0   ;;  %s2000_s12 = smov 0  }
   0x6 LB: > { %s2015_s13 = sadd.s32 4294967295, %s1962_s12   ;;  %s1656_s14 = sadd.s32 4294967294, %s1962_s12   ;;  %s1962_s12 = sphi %s2000_s12, %s2837_s12   ;;  %s1958_s11 = sphi %s1998_s11, %s2836_s11   ;;  %s1954_s10 = sphi %s1996_s10, %s2835_s10   ;;  %s1950_s9 = sphi %s1994_s9, %s2834_s9  }
   0x7   : > { %s2019_s15 = sadd.s32 1, %s1962_s12   ;;  %s26_s16 = sadd.s32 1, %s1958_s11 }
   0x8   : > { %s23_s17 = ssub.s32 %s1962_s12, %s2019_s15  ;;  %p33_p0 = scmp.ne.s32.totalorder %s1958_s11, %s1954_s10 }
   0x9   : > { %p24_p1 = scmp.eq.s32.totalorder %s23_s17, 0  ;;  %p34_p2 = scmp.eq.s32.totalorder %s1962_s12, 0 }
   0xa   : > { %p39_p3 = scmp.ne.s32.totalorder %s1954_s10, %s1950_s9  ;;  %p2817_p4 = scmp.eq.s32.totalorder %s2015_s13, 0 }
   0xb   : > { %s2031_s18 = scalar_select %p24_p1, %s1958_s11, %s26_s16  }
   0xc   : > { %p2033_p5 = por %p34_p2, %p33_p0  ;;  %p2039_p6 = por %p2817_p4, %p39_p3 }
   0xd   : > { %p84_p7 = scmp.eq.s32.totalorder %s2015_s13, 1  ;;  %p90_p8 = scmp.eq.s32.totalorder %s1656_s14, 1 }
   0xe   : > { %s2821_s20 = scalar_select %p2039_p6, 1, 0 }
   0xf   : > { %p1657_p9 = scmp.ge.s32.totalorder %s1962_s12, 1  ;;  %p97_p10 = scmp.lt.s32.totalorder %s1962_s12, 3 }
  0x10   : > { %p2046_p11 = por %p84_p7, %p33_p0  ;;  %p2050_p12 = por %p90_p8, %p39_p3 }
  0x11   : > { %p2054_p13 = pnand %p1657_p9, %p97_p10  ;;  %s110_s26 = sshll.u32 %s2814_s1, 4  ;;  %s111_s26 = int_to_ptr.vmem [resolvable:$true] %s110_s26 }
  0x12   : > { %s2822_s21 = scalar_select %p2046_p11, 1, 0 }
  0x13   : > { %s2823_s22 = scalar_select %p2050_p12, 1, 0 }
  0x14   : > { %s2824_s23 = scalar_select %p2054_p13, 1, 0 }
  0x15   : > { %p1782_p1 = pneg %p2054_p13  ;;  %p1795_p2 = scmp.lt.s32.totalorder %s1962_s12, 2 }
  0x16   : > { %s121_s28 = sand.u32 1, %s1958_s11   ;;  %s1851_s3 = scalar_lea.vmem %s111_s26, 16 }
  0x17   : > { %p2067_p7 = pnand %p1782_p1, %p2817_p4  ;;  %p2074_p3 = pnand %p1795_p2, %p2033_p5 }
  0x18   : > { %s1660_s30 = sshll.u32 %s121_s28, 6  ;;  %p1852_p8 = scmp.ne.s32.totalorder %s111_s26, %s1851_s3 }
  0x19   : > { %p1853_p9 = pneg %p2067_p7  ;;  %p1859_p12 = scmp.lt.s32.totalorder %s111_s26, %s111_s26 }
  0x1a   : > { %p1860_p11 = scmp.lt.s32.totalorder %s1851_s3, %s1851_s3 }
  0x1b   : > { %p1854_p10 = pnand %p1853_p9, %p1852_p8 }
  0x1c   : > { %p1861_p1 = por %p1860_p11, %p1859_p12 }
  0x1d   : > { %p1855_p0 = pneg %p1854_p10 }
  0x1f   : > { %p1862_p4 = pnand %p1861_p1, %p1855_p0 }
  0x21   : > { %1865 = shalt.err (!%p1862_p4)
}
  0x22   : > { %s1964_s4 = smov [#allocation7]   ;;  %s1772_s5 = sshll.u32 %s1962_s12, 10 }
  0x23   : > { %1785 = dma.vmem_to_smem (!%p2067_p7), %s111_s26, 16, %s1964_s4, [#allocation6]  }
  0x24   : > { %s125_s6 = scalar_lea.vmem [#allocation3], %s1660_s30  ;;  %s2086_s16 = scalar_lea.hbm %s2813_s0, %s1772_s5 }
  0x25   : > { %s132_s7 = sshll.u32 %s125_s6, 4  ;;  %s2090_s17 = scalar_lea.sflag [#allocation4], %s121_s28  ;;  %s2088_s7 = int_to_ptr.vmem [resolvable:$true] %s132_s7 }
  0x26   : > { %s1866_s19 = scalar_lea.hbm %s2086_s16, 1024  ;;  %p1868_p5 = pneg %p2074_p3 }
  0x27   : > { %p1867_p4 = scmp.ne.s32.totalorder %s2086_s16, %s1866_s19  ;;  %s1871_s26 = scalar_lea.hbm %s2813_s0, 2048 }
  0x28   : > { %p1872_p0 = scmp.lt.s32.totalorder %s2086_s16, %s2813_s0  ;;  %p1873_p2 = scmp.lt.s32.totalorder %s1871_s26, %s1866_s19 }
  0x29   : > { %p1869_p11 = pnand %p1868_p5, %p1867_p4 }
  0x2a   : > { %p1874_p7 = por %p1873_p2, %p1872_p0 }
  0x2b   : > { %p1870_p12 = pneg %p1869_p11 }
  0x2d   : > { %p1875_p8 = pnand %p1874_p7, %p1870_p12 }
  0x2f   : > { %1878 = shalt.err (!%p1875_p8)
}
  0x30   : > { %s1879_s28 = scalar_lea.vmem %s2088_s7, 1024  ;;  %s1965_s3 = smov [#allocation3]  }
  0x31   : > { %p1880_p9 = scmp.ne.s32.totalorder %s2088_s7, %s1879_s28  ;;  %s1884_s4 = sshll.u32 %s1965_s3, 4  ;;  %s1885_s4 = int_to_ptr.vmem [resolvable:$false] %s1884_s4 }
  0x32   : > { %s1886_s5 = scalar_lea.vmem %s1885_s4, 2048  ;;  %p1887_p4 = scmp.lt.s32.totalorder %s2088_s7, %s1885_s4 }
  0x33   : > { %p1882_p10 = pnand %p1880_p9, %p1868_p5  ;;  %p1888_p11 = scmp.lt.s32.totalorder %s1886_s5, %s1879_s28 }
  0x35   : > { %p1883_p1 = pneg %p1882_p10  ;;  %p1889_p6 = por %p1888_p11, %p1887_p4 }
  0x37   : > { %p1890_p13 = pnand %p1889_p6, %p1883_p1 }
  0x39   : > { %1893 = shalt.err (!%p1890_p13)
}
  0x3a   : > { %s1966_s6 = smov 128   ;;  %s1967_s8 = smov 8  }
  0x3b   : > { %1789 = dma.hbm_to_vmem [thread:$0]  (!%p2074_p3), %s2086_s16, 1024, %s2088_s7, %s2090_s17, %s1966_s6, %s1966_s6, %s1967_s8  }
  0x3c   : > { %p2827_p5 = scmp.ne.s32.totalorder %s2824_s23, 0 }
  0x3d   : > { %s2114_s14 = sand.u32 (!%p2827_p5), 1, %s1954_s10   ;;  %p2828_p6 = scmp.ne.s32.totalorder (!%p2827_p5), %s2821_s20, 0 }
  0x3e   : > { %144 = sbr.rel (%p2827_p5) target bundleno = 708 (0x2c4), region = 28  ;;  %s1664_s19 = sshll.u32 (!%p2827_p5), %s2114_s14, 6 }
  0x3f   : > { %s147_s24 = scalar_lea.sflag (!%p2827_p5), [#allocation4], %s2114_s14  ;;  %s150_s25 = scalar_lea.vmem (!%p2827_p5), [#allocation3], %s1664_s19 }
  0x43   : > { %1937 = dma.done.wait (%p2828_p6), %s147_s24, 1024  }
  0x44   : > { %1939 = vsyncadd (%p2828_p6), %s147_s24, 4294966272  ;;  %p2829_p13 = scmp.eq.s32.totalorder %s2015_s13, 0 }
  0x46   : > { %1941 = dma.done.wait (%p2829_p13), [#allocation6], 16   ;;  %p2830_p3 = pmov %p2829_p13 }
  0x48   : > { %1943 = vsyncadd (%p2830_p3), [#allocation6], 4294967280 }
  0x49   : > { %159 = sfence }
  0x4a   : > { %v192_v0 = vld [vmem:[%s150_s25] sm:$0xff]  ;;  %v194_v1 = vld [vmem:[%s150_s25 + $0x10] sm:$0xff]  ;;  %vm200_vm0 = vcmask 130048   ;;  %v193_v7 = vld [vmem:[%s150_s25 + $0x8] sm:$0xff]  ;;  %vm176_vm1 = vcmask 174080   ;;  %vm179_vm2 = vcmask 23552  }
  0x4b   : > { %v196_v2 = vld [vmem:[%s150_s25 + $0x20] sm:$0xff]  ;;  %v198_v3 = vld [vmem:[%s150_s25 + $0x30] sm:$0xff]  ;;  %v201_v4 = vsel %vm200_vm0, %v192_v0, 0.0  ;;  %v202_v5 = vsel %vm200_vm0, %v194_v1, 0.0  ;;  %v195_v8 = vld [vmem:[%s150_s25 + $0x18] sm:$0xff]  ;;  %v208_v13 = vsel %vm200_vm0, %v193_v7, 0.0 }
  0x4c   : > { %v204_v6 = vsel %vm200_vm0, %v196_v2, 0.0  ;;  %v203_v9 = vadd.f32 %v202_v5, %v201_v4  ;;  %v206_v10 = vsel %vm200_vm0, %v198_v3, 0.0  ;;  %v197_v11 = vld [vmem:[%s150_s25 + $0x28] sm:$0xff]  ;;  %v199_v12 = vld [vmem:[%s150_s25 + $0x38] sm:$0xff]  ;;  %v209_v14 = vsel %vm200_vm0, %v195_v8, 0.0  ;;  %s1969_s20 = smov 3  }
  0x4d   : > { %v210_v15 = vadd.f32 %v209_v14, %v208_v13  ;;  %v211_v16 = vsel %vm200_vm0, %v197_v11, 0.0  ;;  %v213_v17 = vsel %vm200_vm0, %v199_v12, 0.0  ;;  %vm182_vm3 = vcmask 179352   ;;  %s1668_s23 = sld [smem:[#allocation7 + $0x1]]  ;;  %s1970_s16 = smov 127  }
  0x4e   : > { %v205_v18 = vadd.f32 %v204_v6, %v203_v9  ;;  %v1968_v20 = vmov 0.0   ;;  %v218_v21 = vsel %vm200_vm0, %v192_v0, -inf  ;;  %v219_v22 = vsel %vm200_vm0, %v194_v1, -inf  ;;  %s1669_s29 = sld [smem:[#allocation7 + $0x2]]  ;;  %s1971_s27 = smov 126  }
  0x4f   : > { %v212_v19 = vadd.f32 %v211_v16, %v210_v15  ;;  %177 = vst.msk [vmem:[#allocation2] sm:$0x7] %vm176_vm1, %v1968_v20  ;;  %178 = vst.msk [vmem:[#allocation2 + $0x13] sm:$0x7] %vm176_vm1, %v1968_v20  ;;  %v220_v23 = vsel %vm200_vm0, %v196_v2, -inf  ;;  %v222_v26 = vsel %vm200_vm0, %v198_v3, -inf }
  0x50   : > { %180 = vst.msk [vmem:[#allocation2 + $0x3] sm:$0xff] %vm179_vm2, %v1968_v20  ;;  %181 = vst.msk [vmem:[#allocation2 + $0xb] sm:$0xff] %vm179_vm2, %v1968_v20  ;;  %v207_v24 = vadd.f32 %v206_v10, %v205_v18  ;;  %v221_v25 = vmax.f32 %v218_v21, %v220_v23  ;;  %v225_v27 = vsel %vm200_vm0, %v193_v7, -inf  ;;  %v223_v29 = vmax.f32 %v219_v22, %v222_v26  ;;  %s1670_s7 = sld [smem:[#allocation7 + $0x3]]  ;;  %s1972_s28 = smov 125  }
  0x51   : > { %186 = vst.msk [vmem:[#allocation2 + $0x18] sm:$0x7] %vm176_vm1, %v1968_v20  ;;  %187 = vst.msk [vmem:[#allocation2 + $0x2b] sm:$0x7] %vm176_vm1, %v1968_v20  ;;  %v214_v28 = vadd.f32 %v213_v17, %v212_v19  ;;  %v226_v30 = vsel %vm200_vm0, %v195_v8, -inf  ;;  %v227_v31 = vsel %vm200_vm0, %v197_v11, -inf }
  0x52   : > { %188 = vst.msk [vmem:[#allocation2 + $0x1b] sm:$0xff] %vm179_vm2, %v1968_v20  ;;  %189 = vst.msk [vmem:[#allocation2 + $0x23] sm:$0xff] %vm179_vm2, %v1968_v20  ;;  %v216_v32 = vmul.f32 0.25, %v207_v24  ;;  %v228_v33 = vmax.f32 %v225_v27, %v227_v31  ;;  %v229_v34 = vsel %vm200_vm0, %v199_v12, -inf  ;;  %v224_v35 = vmax.f32 %v221_v25, %v223_v29  ;;  %s1671_s17 = sld [smem:[#allocation7 + $0x4]]  ;;  %s1973_s4 = smov 124  }
  0x53   : > { %183 = vst.msk [vmem:[#allocation2 + $0x3] sm:$0xff] %vm182_vm3, %v1968_v20  ;;  %184 = vst.msk [vmem:[#allocation2 + $0xb] sm:$0xff] %vm182_vm3, %v1968_v20  ;;  %v230_v36 = vmax.f32 %v226_v30, %v229_v34  ;;  %v217_v37 = vmul.f32 0.25, %v214_v28  ;;  %vm240_vm4 = vcmask 154648   ;;  %v264_v43 = vstv %s1668_s23  ;;  %s1672_s26 = sld [smem:[#allocation7 + $0x5]]  ;;  %s1974_s6 = smov 123  }
  0x54   : > { %190 = vst.msk [vmem:[#allocation2 + $0x1b] sm:$0xff] %vm182_vm3, %v1968_v20  ;;  %191 = vst.msk [vmem:[#allocation2 + $0x23] sm:$0xff] %vm182_vm3, %v1968_v20  ;;  %234 = vrot.lane.b32.xlu0 %v216_v32, %s1969_s20  ;;  %245 = vrot.lane.b32.xlu1 %v224_v35, %s1969_s20  ;;  %v278_v46 = vstv %s1669_s29  ;;  %s1673_s30 = sld [smem:[#allocation7 + $0x6]]  ;;  %s1975_s19 = smov 122  }
  0x55   : > { %v231_v38 = vmax.f32 %v228_v33, %v230_v36  ;;  %s1675_s3 = sld [smem:[#allocation7 + $0x8]]  ;;  %p2831_p0 = scmp.ne.s32.totalorder %s2822_s21, 0 }
  0x56   : > { %v292_v50 = vstv %s1670_s7  ;;  %s1676_s5 = sld [smem:[#allocation7 + $0x9]] }
  0x57   : > { %s1677_s8 = sld [smem:[#allocation7 + $0xa]] }
  0x58   : > { %236 = vrot.lane.b32.xlu0 %v217_v37, %s1969_s20  ;;  %247 = vrot.lane.b32.xlu1 %v231_v38, %s1969_s20  ;;  %v306_v53 = vstv %s1671_s17  ;;  %s1678_s24 = sld [smem:[#allocation7 + $0xb]] }
  0x59   : > { %v320_v56 = vstv %s1672_s26  ;;  %s1679_s25 = sld [smem:[#allocation7 + $0xc]] }
  0x5a   : > { %v334_v59 = vstv %s1673_s30  ;;  %s1680_s20 = sld [smem:[#allocation7 + $0xd]] }
  0x5b   : > { %v356_v63 = vstv %s1675_s3  ;;  %s1682_s23 = sld [smem:[#allocation7 + $0xf]] }
  0x5c   : > { %v370_v3 = vstv %s1676_s5  ;;  %s1683_s29 = sld [smem:[#allocation7 + $0x10]] }
  0x5d   : > { %v384_v6 = vstv %s1677_s8  ;;  %s1684_s7 = sld [smem:[#allocation7 + $0x11]] }
  0x5e   : > { %v398_v9 = vstv %s1678_s24  ;;  %s1685_s17 = sld [smem:[#allocation7 + $0x12]] }
  0x5f   : > { %v412_v12 = vstv %s1679_s25  ;;  %s1686_s26 = sld [smem:[#allocation7 + $0x13]] }
  0x60   : > { %v426_v15 = vstv %s1680_s20  ;;  %s1687_s30 = sld [smem:[#allocation7 + $0x14]] }
  0x61   : > { %v448_v19 = vstv %s1682_s23  ;;  %s1689_s3 = sld [smem:[#allocation7 + $0x16]] }
  0x62   : > { %v462_v23 = vstv %s1683_s29  ;;  %s1690_s5 = sld [smem:[#allocation7 + $0x17]] }
  0x63   : > { %v476_v26 = vstv %s1684_s7  ;;  %s1691_s8 = sld [smem:[#allocation7 + $0x18]] }
  0x64   : > { %v490_v29 = vstv %s1685_s17  ;;  %s1692_s24 = sld [smem:[#allocation7 + $0x19]] }
  0x65   : > { %v504_v32 = vstv %s1686_s26  ;;  %s1693_s25 = sld [smem:[#allocation7 + $0x1a]] }
  0x66   : > { %v518_v35 = vstv %s1687_s30  ;;  %s1694_s20 = sld [smem:[#allocation7 + $0x1b]] }
  0x67   : > { %s1696_s23 = sld [smem:[#allocation7 + $0x1d]] }
  0x68   : > { %s1697_s29 = sld [smem:[#allocation7 + $0x1e]] }
  0x69   : > { %s1698_s7 = sld [smem:[#allocation7 + $0x1f]] }
  0x6a   : > { %s1699_s17 = sld [smem:[#allocation7 + $0x20]] }
  0x6b   : > { %s1700_s26 = sld [smem:[#allocation7 + $0x21]] }
  0x6c   : > { %s1701_s30 = sld [smem:[#allocation7 + $0x22]] }
  0xc6   : > { %v235_v39 = vpop.permute.xlu0 %234  ;;  %v246_v40 = vpop.permute.xlu1 %245 }
  0xc7   : > { %241 = vst.msk [vmem:[#allocation2 + $0x3] sm:$0xff] %vm240_vm4, %v235_v39  ;;  %251 = vst.msk [vmem:[#allocation2 + $0x1b] sm:$0xff] %vm240_vm4, %v246_v40  ;;  %v540_v39 = vstv %s1689_s3  ;;  %s2275_s3 = sld [smem:[#allocation7 + $0x24]] }
  0xca   : > { %v237_v41 = vpop.permute.xlu0 %236  ;;  %v248_v42 = vpop.permute.xlu1 %247 }
  0xcb   : > { %242 = vst.msk [vmem:[#allocation2 + $0xb] sm:$0xff] %vm240_vm4, %v237_v41  ;;  %252 = vst.msk [vmem:[#allocation2 + $0x23] sm:$0xff] %vm240_vm4, %v248_v42 }
  0xce   : > { %v2146_v44 = vld [vmem:[#allocation2] sm:$0xff] }
  0xcf   : > { %v265_v45 = vmul.f32 %v264_v43, %v2146_v44  ;;  %v279_v49 = vmul.f32 %v278_v46, %v2146_v44  ;;  %v293_v52 = vmul.f32 %v292_v50, %v2146_v44  ;;  %v307_v55 = vmul.f32 %v306_v53, %v2146_v44  ;;  %v2170_v62 = vld [vmem:[#allocation2 + $0x1] sm:$0xff] }
  0xd0   : > { %v321_v58 = vmul.f32 %v320_v56, %v2146_v44  ;;  %v335_v61 = vmul.f32 %v334_v59, %v2146_v44  ;;  %v357_v2 = vmul.f32 %v356_v63, %v2170_v62  ;;  %v371_v5 = vmul.f32 %v370_v3, %v2170_v62  ;;  %v2198_v18 = vld [vmem:[#allocation2 + $0x2] sm:$0xff] }
  0xd1   : > { %269 = vrot.lane.b32.xlu0 %v265_v45, %s1970_s16  ;;  %v385_v8 = vmul.f32 %v384_v6, %v2170_v62  ;;  %v399_v11 = vmul.f32 %v398_v9, %v2170_v62  ;;  %v413_v14 = vmul.f32 %v412_v12, %v2170_v62  ;;  %v427_v17 = vmul.f32 %v426_v15, %v2170_v62  ;;  %v2226_v38 = vld [vmem:[#allocation2 + $0x3] sm:$0xff] }
  0xd2   : > { %v2150_v47 = vld [vmem:[#allocation2 + $0x8] sm:$0xff]  ;;  %v449_v22 = vmul.f32 %v448_v19, %v2198_v18  ;;  %v463_v25 = vmul.f32 %v462_v23, %v2198_v18  ;;  %v477_v28 = vmul.f32 %v476_v26, %v2198_v18  ;;  %v491_v31 = vmul.f32 %v490_v29, %v2198_v18 }
  0xd3   : > { %v266_v48 = vmul.f32 %v264_v43, %v2150_v47  ;;  %v280_v51 = vmul.f32 %v278_v46, %v2150_v47  ;;  %v294_v54 = vmul.f32 %v292_v50, %v2150_v47  ;;  %v308_v57 = vmul.f32 %v306_v53, %v2150_v47  ;;  %v2175_v1 = vld [vmem:[#allocation2 + $0x9] sm:$0xff] }
  0xd4   : > { %v322_v60 = vmul.f32 %v320_v56, %v2150_v47  ;;  %v336_v0 = vmul.f32 %v334_v59, %v2150_v47  ;;  %v358_v4 = vmul.f32 %v356_v63, %v2175_v1  ;;  %v372_v7 = vmul.f32 %v370_v3, %v2175_v1  ;;  %v2203_v21 = vld [vmem:[#allocation2 + $0xa] sm:$0xff] }
  0xd5   : > { %271 = vrot.lane.b32.xlu1 %v266_v48, %s1970_s16  ;;  %283 = vrot.lane.b32.xlu0 %v279_v49, %s1971_s27  ;;  %v386_v10 = vmul.f32 %v384_v6, %v2175_v1  ;;  %v400_v13 = vmul.f32 %v398_v9, %v2175_v1  ;;  %v414_v16 = vmul.f32 %v412_v12, %v2175_v1  ;;  %v2231_v41 = vld [vmem:[#allocation2 + $0xb] sm:$0xff]  ;;  %v554_v43 = vstv %s1690_s5  ;;  %s2277_s5 = sld [smem:[#allocation7]] }
  0xd6   : > { %v428_v20 = vmul.f32 %v426_v15, %v2175_v1  ;;  %v450_v24 = vmul.f32 %v448_v19, %v2203_v21  ;;  %v464_v27 = vmul.f32 %v462_v23, %v2203_v21  ;;  %v478_v30 = vmul.f32 %v476_v26, %v2203_v21  ;;  %v2299_v26 = vld [vmem:[#allocation2 + $0xd] sm:$0xff] }
  0xd7   : > { %v492_v33 = vmul.f32 %v490_v29, %v2203_v21  ;;  %v505_v34 = vmul.f32 %v504_v32, %v2198_v18  ;;  %v506_v36 = vmul.f32 %v504_v32, %v2203_v21  ;;  %v519_v37 = vmul.f32 %v518_v35, %v2198_v18 }
  0xd8   : > { %v520_v40 = vmul.f32 %v518_v35, %v2203_v21  ;;  %v541_v42 = vmul.f32 %v540_v39, %v2226_v38  ;;  %v542_v45 = vmul.f32 %v540_v39, %v2231_v41  ;;  %v555_v46 = vmul.f32 %v554_v43, %v2226_v38 }
  0xd9   : > { %285 = vrot.lane.b32.xlu1 %v280_v51, %s1971_s27  ;;  %297 = vrot.lane.b32.xlu0 %v293_v52, %s1972_s28  ;;  %v568_v48 = vstv %s1691_s8  ;;  %v556_v49 = vmul.f32 %v554_v43, %v2231_v41  ;;  %v582_v51 = vstv %s1692_s24  ;;  %s2283_s8 = sld [smem:[#allocation7 + $0x25]] }
  0xda   : > { %v569_v50 = vmul.f32 %v568_v48, %v2226_v38  ;;  %v570_v52 = vmul.f32 %v568_v48, %v2231_v41  ;;  %v583_v53 = vmul.f32 %v582_v51, %v2226_v38  ;;  %v646_v3 = vstv %s1697_s29  ;;  %s2285_s24 = sld [smem:[#allocation7 + $0x62]] }
  0xdb   : > { %v660_v6 = vstv %s1698_s7  ;;  %v674_v9 = vstv %s1699_s17  ;;  %v688_v12 = vstv %s1700_s26  ;;  %v702_v15 = vstv %s1701_s30  ;;  %s2316_s29 = sld [smem:[#allocation7 + $0x7]] }
  0xdc   : > { %v258_v23 = vstv %s2277_s5  ;;  %s2323_s7 = sld [smem:[#allocation7 + $0x29]] }
  0xdd   : > { %299 = vrot.lane.b32.xlu1 %v294_v54, %s1972_s28  ;;  %311 = vrot.lane.b32.xlu0 %v307_v55, %s1973_s4  ;;  %v596_v54 = vstv %s1693_s25  ;;  %v584_v55 = vmul.f32 %v582_v51, %v2231_v41  ;;  %s2294_s25 = sld [smem:[#allocation7 + $0x26]]  ;;  %v259_v29 = vmul.f32 %v258_v23, %v2146_v44 }
  0xde   : > { %v597_v56 = vmul.f32 %v596_v54, %v2226_v38  ;;  %s2330_s17 = sld [smem:[#allocation7 + $0x2b]] }
  0xdf   : > { %s2339_s26 = sld [smem:[#allocation7 + $0x2c]] }
  0xe0   : > { %s2349_s30 = sld [smem:[#allocation7 + $0x2d]] }
  0xe1   : > { %313 = vrot.lane.b32.xlu1 %v308_v57, %s1973_s4  ;;  %325 = vrot.lane.b32.xlu0 %v321_v58, %s1974_s6  ;;  %v610_v57 = vstv %s1694_s20  ;;  %v598_v58 = vmul.f32 %v596_v54, %v2231_v41  ;;  %s2305_s20 = sld [smem:[#allocation7 + $0x27]] }
  0xe2   : > { %v611_v59 = vmul.f32 %v610_v57, %v2226_v38  ;;  %v612_v63 = vmul.f32 %v610_v57, %v2231_v41  ;;  %s2365_s5 = sld [smem:[#allocation7 + $0x2f]] }
  0xe3   : > { %v752_v44 = vstv %s2294_s25  ;;  %s2381_s25 = sld [smem:[#allocation7 + $0x32]] }
  0xe5   : > { %327 = vrot.lane.b32.xlu1 %v322_v60, %s1974_s6  ;;  %339 = vrot.lane.b32.xlu0 %v335_v61, %s1975_s19  ;;  %v2254_v60 = vld [vmem:[#allocation2 + $0x4] sm:$0xff]  ;;  %v632_v61 = vstv %s1696_s23  ;;  %s2314_s23 = sld [smem:[#allocation7 + $0x28]] }
  0xe6   : > { %v703_v19 = vmul.f32 %v702_v15, %v2254_v60 }
  0xe7   : > { %v766_v48 = vstv %s2305_s20  ;;  %s2390_s20 = sld [smem:[#allocation7 + $0x33]] }
  0xe9   : > { %341 = vrot.lane.b32.xlu1 %v336_v0, %s1975_s19  ;;  %361 = vrot.lane.b32.xlu0 %v357_v2, %s1970_s16  ;;  %v2259_v0 = vld [vmem:[#allocation2 + $0xc] sm:$0xff]  ;;  %v633_v2 = vmul.f32 %v632_v61, %v2254_v60 }
  0xeb   : > { %v780_v57 = vstv %s2314_s23  ;;  %s2400_s23 = sld [smem:[#allocation7 + $0x34]] }
  0xed   : > { %363 = vrot.lane.b32.xlu1 %v358_v4, %s1970_s16  ;;  %375 = vrot.lane.b32.xlu0 %v371_v5, %s1971_s27  ;;  %v634_v4 = vmul.f32 %v632_v61, %v2259_v0  ;;  %v647_v5 = vmul.f32 %v646_v3, %v2254_v60 }
  0xf1   : > { %377 = vrot.lane.b32.xlu1 %v372_v7, %s1971_s27  ;;  %389 = vrot.lane.b32.xlu0 %v385_v8, %s1972_s28  ;;  %v648_v7 = vmul.f32 %v646_v3, %v2259_v0  ;;  %v661_v8 = vmul.f32 %v660_v6, %v2254_v60 }
  0xf5   : > { %391 = vrot.lane.b32.xlu1 %v386_v10, %s1972_s28  ;;  %403 = vrot.lane.b32.xlu0 %v399_v11, %s1973_s4  ;;  %v662_v10 = vmul.f32 %v660_v6, %v2259_v0  ;;  %v675_v11 = vmul.f32 %v674_v9, %v2254_v60 }
  0xf9   : > { %405 = vrot.lane.b32.xlu1 %v400_v13, %s1973_s4  ;;  %417 = vrot.lane.b32.xlu0 %v413_v14, %s1974_s6  ;;  %v676_v13 = vmul.f32 %v674_v9, %v2259_v0  ;;  %v689_v14 = vmul.f32 %v688_v12, %v2254_v60 }
  0xfd   : > { %419 = vrot.lane.b32.xlu1 %v414_v16, %s1974_s6  ;;  %431 = vrot.lane.b32.xlu0 %v427_v17, %s1975_s19  ;;  %v690_v17 = vmul.f32 %v688_v12, %v2259_v0  ;;  %v782_v12 = vmul.f32 %v780_v57, %v2299_v26 }
 0x101   : > { %433 = vrot.lane.b32.xlu1 %v428_v20, %s1975_s19  ;;  %453 = vrot.lane.b32.xlu0 %v449_v22, %s1970_s16  ;;  %v2290_v20 = vld [vmem:[#allocation2 + $0x5] sm:$0xff]  ;;  %v724_v22 = vstv %s2275_s3  ;;  %s2358_s3 = sld [smem:[#allocation7 + $0x2e]] }
 0x105   : > { %455 = vrot.lane.b32.xlu1 %v450_v24, %s1970_s16  ;;  %467 = vrot.lane.b32.xlu0 %v463_v25, %s1971_s27  ;;  %v704_v25 = vmul.f32 %v702_v15, %v2259_v0 }
 0x109   : > { %469 = vrot.lane.b32.xlu1 %v464_v27, %s1971_s27  ;;  %481 = vrot.lane.b32.xlu0 %v477_v28, %s1972_s28  ;;  %v725_v28 = vmul.f32 %v724_v22, %v2290_v20 }
 0x10d   : > { %483 = vrot.lane.b32.xlu1 %v478_v30, %s1972_s28  ;;  %495 = vrot.lane.b32.xlu0 %v491_v31, %s1973_s4  ;;  %v738_v30 = vstv %s2283_s8  ;;  %v254_v31 = vstv %s2285_s24  ;;  %s2367_s8 = sld [smem:[#allocation7 + $0xe]] }
 0x10e   : > { %s2374_s24 = sld [smem:[#allocation7 + $0x30]] }
 0x111   : > { %497 = vrot.lane.b32.xlu1 %v492_v33, %s1973_s4  ;;  %509 = vrot.lane.b32.xlu0 %v505_v34, %s1974_s6  ;;  %v726_v33 = vmul.f32 %v724_v22, %v2299_v26  ;;  %v260_v34 = vmul.f32 %v258_v23, %v2150_v47 }
 0x113   : > { %v262_v43 = vadd.f32 %v260_v34, %v254_v31 }
 0x115   : > { %511 = vrot.lane.b32.xlu1 %v506_v36, %s1974_s6  ;;  %523 = vrot.lane.b32.xlu0 %v519_v37, %s1975_s19  ;;  %v739_v36 = vmul.f32 %v738_v30, %v2290_v20  ;;  %v261_v37 = vadd.f32 %v259_v29, %v254_v31 }
 0x119   : > { %525 = vrot.lane.b32.xlu1 %v520_v40, %s1975_s19  ;;  %545 = vrot.lane.b32.xlu0 %v541_v42, %s1970_s16  ;;  %v740_v42 = vmul.f32 %v738_v30, %v2299_v26 }
 0x11d   : > { %547 = vrot.lane.b32.xlu1 %v542_v45, %s1970_s16  ;;  %559 = vrot.lane.b32.xlu0 %v555_v46, %s1971_s27  ;;  %v753_v45 = vmul.f32 %v752_v44, %v2290_v20 }
 0x121   : > { %561 = vrot.lane.b32.xlu1 %v556_v49, %s1971_s27  ;;  %573 = vrot.lane.b32.xlu0 %v569_v50, %s1972_s28 }
 0x125   : > { %575 = vrot.lane.b32.xlu1 %v570_v52, %s1972_s28  ;;  %587 = vrot.lane.b32.xlu0 %v583_v53, %s1973_s4  ;;  %v754_v52 = vmul.f32 %v752_v44, %v2299_v26 }
 0x129   : > { %589 = vrot.lane.b32.xlu1 %v584_v55, %s1973_s4  ;;  %601 = vrot.lane.b32.xlu0 %v597_v56, %s1974_s6  ;;  %v767_v55 = vmul.f32 %v766_v48, %v2290_v20 }
 0x12d   : > { %603 = vrot.lane.b32.xlu1 %v598_v58, %s1974_s6  ;;  %615 = vrot.lane.b32.xlu0 %v611_v59, %s1975_s19  ;;  %v350_v58 = vstv %s2316_s29  ;;  %s2409_s29 = sld [smem:[#allocation7 + $0x35]] }
 0x12e   : > { %v351_v6 = vmul.f32 %v350_v58, %v2170_v62 }
 0x131   : > { %617 = vrot.lane.b32.xlu1 %v612_v63, %s1975_s19  ;;  %637 = vrot.lane.b32.xlu0 %v633_v2, %s1970_s16  ;;  %v768_v2 = vmul.f32 %v766_v48, %v2299_v26 }
 0x135   : > { %639 = vrot.lane.b32.xlu1 %v634_v4, %s1970_s16  ;;  %651 = vrot.lane.b32.xlu0 %v647_v5, %s1971_s27  ;;  %v781_v5 = vmul.f32 %v780_v57, %v2290_v20 }
 0x139   : > { %653 = vrot.lane.b32.xlu1 %v648_v7, %s1971_s27  ;;  %665 = vrot.lane.b32.xlu0 %v661_v8, %s1972_s28  ;;  %v794_v8 = vstv %s2323_s7  ;;  %s2416_s7 = sld [smem:[#allocation7 + $0x36]] }
 0x13a   : > { %v795_v62 = vmul.f32 %v794_v8, %v2290_v20  ;;  %v796_v23 = vmul.f32 %v794_v8, %v2299_v26 }
 0x13d   : > { %667 = vrot.lane.b32.xlu1 %v662_v10, %s1972_s28  ;;  %679 = vrot.lane.b32.xlu0 %v675_v11, %s1973_s4 }
 0x141   : > { %681 = vrot.lane.b32.xlu1 %v676_v13, %s1973_s4  ;;  %693 = vrot.lane.b32.xlu0 %v689_v14, %s1974_s6  ;;  %v352_v13 = vmul.f32 %v350_v58, %v2175_v1  ;;  %v2353_v1 = vld [vmem:[#allocation2 + $0xe] sm:$0xff] }
 0x143   : > { %v270_v16 = vpop.permute.xlu0 %269 }
 0x144   : > { %v275_v39 = vadd.f32 %v270_v16, %v261_v37  ;;  %v2345_v16 = vld [vmem:[#allocation2 + $0x6] sm:$0xff] }
 0x145   : > { %695 = vrot.lane.b32.xlu1 %v690_v17, %s1974_s6  ;;  %707 = vrot.lane.b32.xlu0 %v703_v19, %s1975_s19  ;;  %v816_v17 = vstv %s2330_s17  ;;  %s2418_s17 = sld [smem:[#allocation7 + $0x15]] }
 0x146   : > { %v818_v29 = vmul.f32 %v816_v17, %v2353_v1 }
 0x147   : > { %v272_v24 = vpop.permute.xlu1 %271  ;;  %v284_v27 = vpop.permute.xlu0 %283 }
 0x148   : > { %v289_v46 = vadd.f32 %v284_v27, %v275_v39  ;;  %v276_v49 = vadd.f32 %v272_v24, %v262_v43  ;;  %v830_v27 = vstv %s2339_s26  ;;  %v858_v39 = vstv %s2358_s3  ;;  %s2425_s26 = sld [smem:[#allocation7 + $0x37]] }
 0x149   : > { %709 = vrot.lane.b32.xlu1 %v704_v25, %s1975_s19  ;;  %729 = vrot.lane.b32.xlu0 %v725_v28, %s1970_s16  ;;  %v817_v25 = vmul.f32 %v816_v17, %v2345_v16  ;;  %v831_v31 = vmul.f32 %v830_v27, %v2345_v16  ;;  %v859_v48 = vmul.f32 %v858_v39, %v2345_v16  ;;  %s2441_s3 = sld [smem:[#allocation7 + $0x3a]] }
 0x14b   : > { %v286_v32 = vpop.permute.xlu1 %285  ;;  %v298_v35 = vpop.permute.xlu0 %297 }
 0x14c   : > { %v303_v50 = vadd.f32 %v298_v35, %v289_v46  ;;  %v290_v53 = vadd.f32 %v286_v32, %v276_v49  ;;  %v844_v32 = vstv %s2349_s30  ;;  %v832_v35 = vmul.f32 %v830_v27, %v2353_v1  ;;  %s2432_s30 = sld [smem:[#allocation7 + $0x39]] }
 0x14d   : > { %731 = vrot.lane.b32.xlu1 %v726_v33, %s1970_s16  ;;  %743 = vrot.lane.b32.xlu0 %v739_v36, %s1971_s27  ;;  %v845_v37 = vmul.f32 %v844_v32, %v2345_v16 }
 0x14f   : > { %v300_v40 = vpop.permute.xlu1 %299  ;;  %v312_v47 = vpop.permute.xlu0 %311 }
 0x150   : > { %v317_v56 = vadd.f32 %v312_v47, %v303_v50  ;;  %v304_v59 = vadd.f32 %v300_v40, %v290_v53  ;;  %v846_v47 = vmul.f32 %v844_v32, %v2353_v1  ;;  %v872_v50 = vstv %s2365_s5  ;;  %s2451_s5 = sld [smem:[#allocation7 + $0x3b]] }
 0x151   : > { %745 = vrot.lane.b32.xlu1 %v740_v42, %s1971_s27  ;;  %757 = vrot.lane.b32.xlu0 %v753_v45, %s1972_s28  ;;  %v873_v58 = vmul.f32 %v872_v50, %v2345_v16  ;;  %v950_v32 = vstv %s2409_s29  ;;  %s2492_s29 = sld [smem:[#allocation7 + $0x41]] }
 0x153   : > { %v314_v51 = vpop.permute.xlu1 %313  ;;  %v326_v54 = vpop.permute.xlu0 %325 }
 0x154   : > { %v331_v61 = vadd.f32 %v326_v54, %v317_v56  ;;  %v318_v3 = vadd.f32 %v314_v51, %v304_v59  ;;  %v442_v51 = vstv %s2367_s8  ;;  %s2460_s8 = sld [smem:[#allocation7 + $0x3c]] }
 0x155   : > { %759 = vrot.lane.b32.xlu1 %v754_v52, %s1972_s28  ;;  %771 = vrot.lane.b32.xlu0 %v767_v55, %s1973_s4  ;;  %v860_v55 = vmul.f32 %v858_v39, %v2353_v1  ;;  %v443_v59 = vmul.f32 %v442_v51, %v2198_v18 }
 0x157   : > { %v328_v63 = vpop.permute.xlu1 %327  ;;  %v340_v4 = vpop.permute.xlu0 %339 }
 0x158   : > { %v345_v7 = vadd.f32 %v340_v4, %v331_v61  ;;  %v332_v9 = vadd.f32 %v328_v63, %v318_v3  ;;  %v886_v63 = vstv %s2374_s24  ;;  %s2467_s24 = sld [smem:[#allocation7 + $0x3d]] }
 0x159   : > { %773 = vrot.lane.b32.xlu1 %v768_v2, %s1973_s4  ;;  %785 = vrot.lane.b32.xlu0 %v781_v5, %s1974_s6  ;;  %v874_v5 = vmul.f32 %v872_v50, %v2353_v1  ;;  %v887_v18 = vmul.f32 %v886_v63, %v2345_v16 }
 0x15a   : > { %v353_v10 = vadd.f32 %v351_v6, %v345_v7  ;;  %v444_v6 = vmul.f32 %v442_v51, %v2203_v21 }
 0x15b   : > { %v342_v11 = vpop.permute.xlu1 %341  ;;  %v362_v15 = vpop.permute.xlu0 %361 }
 0x15c   : > { %v346_v14 = vadd.f32 %v342_v11, %v332_v9  ;;  %v367_v33 = vadd.f32 %v362_v15, %v353_v10  ;;  %v2397_v9 = vld [vmem:[#allocation2 + $0x18] sm:$0xff]  ;;  %v908_v10 = vstv %s2381_s25  ;;  %v2405_v15 = vld [vmem:[#allocation2 + $0x20] sm:$0xff]  ;;  %s2469_s25 = sld [smem:[#allocation7 + $0x1c]] }
 0x15d   : > { %787 = vrot.lane.b32.xlu1 %v782_v12, %s1974_s6  ;;  %799 = vrot.lane.b32.xlu0 %v795_v62, %s1975_s19  ;;  %v922_v62 = vstv %s2390_s20  ;;  %v951_v39 = vmul.f32 %v950_v32, %v2397_v9  ;;  %s2476_s20 = sld [smem:[#allocation7 + $0x3e]] }
 0x15e   : > { %v354_v19 = vadd.f32 %v352_v13, %v346_v14  ;;  %v888_v13 = vmul.f32 %v886_v63, %v2353_v1  ;;  %v909_v14 = vmul.f32 %v908_v10, %v2397_v9 }
 0x15f   : > { %v364_v22 = vpop.permute.xlu1 %363  ;;  %v376_v24 = vpop.permute.xlu0 %375 }
 0x160   : > { %v381_v44 = vadd.f32 %v376_v24, %v367_v33  ;;  %v368_v40 = vadd.f32 %v364_v22, %v354_v19  ;;  %v910_v19 = vmul.f32 %v908_v10, %v2405_v15  ;;  %v936_v24 = vstv %s2400_s23  ;;  %s2483_s23 = sld [smem:[#allocation7 + $0x40]] }
 0x161   : > { %801 = vrot.lane.b32.xlu1 %v796_v23, %s1975_s19  ;;  %821 = vrot.lane.b32.xlu0 %v817_v25, %s1970_s16  ;;  %v923_v23 = vmul.f32 %v922_v62, %v2397_v9 }
 0x163   : > { %v378_v28 = vpop.permute.xlu1 %377  ;;  %v390_v30 = vpop.permute.xlu0 %389 }
 0x164   : > { %v395_v42 = vadd.f32 %v390_v30, %v381_v44  ;;  %v382_v45 = vadd.f32 %v378_v28, %v368_v40  ;;  %v924_v28 = vmul.f32 %v922_v62, %v2405_v15  ;;  %v937_v30 = vmul.f32 %v936_v24, %v2397_v9 }
 0x165   : > { %823 = vrot.lane.b32.xlu1 %v818_v29, %s1970_s16  ;;  %835 = vrot.lane.b32.xlu0 %v831_v31, %s1971_s27 }
 0x167   : > { %v392_v34 = vpop.permute.xlu1 %391  ;;  %v404_v36 = vpop.permute.xlu0 %403 }
 0x168   : > { %v409_v49 = vadd.f32 %v404_v36, %v395_v42  ;;  %v396_v52 = vadd.f32 %v392_v34, %v382_v45  ;;  %v938_v36 = vmul.f32 %v936_v24, %v2405_v15  ;;  %v964_v42 = vstv %s2416_s7  ;;  %s2502_s7 = sld [smem:[#allocation7 + $0x42]] }
 0x169   : > { %837 = vrot.lane.b32.xlu1 %v832_v35, %s1971_s27  ;;  %849 = vrot.lane.b32.xlu0 %v845_v37, %s1972_s28  ;;  %v965_v51 = vmul.f32 %v964_v42, %v2397_v9  ;;  %v1042_v24 = vstv %s2460_s8  ;;  %s2543_s8 = sld [smem:[#allocation7 + $0x48]] }
 0x16b   : > { %v406_v43 = vpop.permute.xlu1 %405  ;;  %v418_v46 = vpop.permute.xlu0 %417 }
 0x16c   : > { %v423_v53 = vadd.f32 %v418_v46, %v409_v49  ;;  %v410_v56 = vadd.f32 %v406_v43, %v396_v52  ;;  %v534_v43 = vstv %s2418_s17  ;;  %s2511_s17 = sld [smem:[#allocation7 + $0x43]] }
 0x16d   : > { %851 = vrot.lane.b32.xlu1 %v846_v47, %s1972_s28  ;;  %863 = vrot.lane.b32.xlu0 %v859_v48, %s1973_s4  ;;  %v952_v48 = vmul.f32 %v950_v32, %v2405_v15  ;;  %v535_v52 = vmul.f32 %v534_v43, %v2226_v38 }
 0x16f   : > { %v420_v54 = vpop.permute.xlu1 %419  ;;  %v432_v57 = vpop.permute.xlu0 %431 }
 0x170   : > { %v437_v61 = vadd.f32 %v432_v57, %v423_v53  ;;  %v424_v2 = vadd.f32 %v420_v54, %v410_v56  ;;  %v978_v54 = vstv %s2425_s26  ;;  %s2518_s26 = sld [smem:[#allocation7 + $0x44]] }
 0x171   : > { %865 = vrot.lane.b32.xlu1 %v860_v55, %s1973_s4  ;;  %877 = vrot.lane.b32.xlu0 %v873_v58, %s1974_s6  ;;  %v966_v58 = vmul.f32 %v964_v42, %v2405_v15  ;;  %v979_v38 = vmul.f32 %v978_v54, %v2397_v9 }
 0x172   : > { %v445_v3 = vadd.f32 %v443_v59, %v437_v61  ;;  %v536_v59 = vmul.f32 %v534_v43, %v2231_v41 }
 0x173   : > { %v434_v4 = vpop.permute.xlu1 %433  ;;  %v454_v8 = vpop.permute.xlu0 %453 }
 0x174   : > { %v438_v7 = vadd.f32 %v434_v4, %v424_v2  ;;  %v459_v25 = vadd.f32 %v454_v8, %v445_v3  ;;  %v2448_v2 = vld [vmem:[#allocation2 + $0x19] sm:$0xff]  ;;  %v1000_v3 = vstv %s2432_s30  ;;  %v2456_v8 = vld [vmem:[#allocation2 + $0x21] sm:$0xff]  ;;  %s2520_s30 = sld [smem:[#allocation7 + $0x23]] }
 0x175   : > { %879 = vrot.lane.b32.xlu1 %v874_v5, %s1974_s6  ;;  %891 = vrot.lane.b32.xlu0 %v887_v18, %s1975_s19  ;;  %v1014_v18 = vstv %s2441_s3  ;;  %v1043_v32 = vmul.f32 %v1042_v24, %v2448_v2  ;;  %s2527_s3 = sld [smem:[#allocation7 + $0x45]] }
 0x176   : > { %v446_v11 = vadd.f32 %v444_v6, %v438_v7  ;;  %v980_v6 = vmul.f32 %v978_v54, %v2405_v15  ;;  %v1001_v7 = vmul.f32 %v1000_v3, %v2448_v2 }
 0x177   : > { %v456_v12 = vpop.permute.xlu1 %455  ;;  %v468_v21 = vpop.permute.xlu0 %467 }
 0x178   : > { %v473_v31 = vadd.f32 %v468_v21, %v459_v25  ;;  %v460_v33 = vadd.f32 %v456_v12, %v446_v11  ;;  %v1002_v11 = vmul.f32 %v1000_v3, %v2456_v8  ;;  %v1028_v21 = vstv %s2451_s5  ;;  %s2534_s5 = sld [smem:[#allocation7 + $0x47]] }
 0x179   : > { %893 = vrot.lane.b32.xlu1 %v888_v13, %s1975_s19  ;;  %913 = vrot.lane.b32.xlu0 %v909_v14, %s1970_s16  ;;  %v1015_v13 = vmul.f32 %v1014_v18, %v2448_v2 }
 0x17b   : > { %v470_v17 = vpop.permute.xlu1 %469  ;;  %v482_v22 = vpop.permute.xlu0 %481 }
 0x17c   : > { %v487_v34 = vadd.f32 %v482_v22, %v473_v31  ;;  %v474_v37 = vadd.f32 %v470_v17, %v460_v33  ;;  %v1016_v17 = vmul.f32 %v1014_v18, %v2456_v8  ;;  %v1029_v22 = vmul.f32 %v1028_v21, %v2448_v2 }
 0x17d   : > { %915 = vrot.lane.b32.xlu1 %v910_v19, %s1970_s16  ;;  %927 = vrot.lane.b32.xlu0 %v923_v23, %s1971_s27 }
 0x17f   : > { %v484_v27 = vpop.permute.xlu1 %483  ;;  %v496_v29 = vpop.permute.xlu0 %495 }
 0x180   : > { %v501_v40 = vadd.f32 %v496_v29, %v487_v34  ;;  %v488_v47 = vadd.f32 %v484_v27, %v474_v37  ;;  %v1030_v29 = vmul.f32 %v1028_v21, %v2456_v8  ;;  %v1056_v34 = vstv %s2467_s24  ;;  %s2553_s24 = sld [smem:[#allocation7 + $0x49]] }
 0x181   : > { %929 = vrot.lane.b32.xlu1 %v924_v28, %s1971_s27  ;;  %941 = vrot.lane.b32.xlu0 %v937_v30, %s1972_s28  ;;  %v1057_v43 = vmul.f32 %v1056_v34, %v2448_v2  ;;  %v1134_v21 = vstv %s2511_s17  ;;  %s2594_s17 = sld [smem:[#allocation7 + $0x4f]] }
 0x183   : > { %v498_v35 = vpop.permute.xlu1 %497  ;;  %v510_v44 = vpop.permute.xlu0 %509 }
 0x184   : > { %v515_v45 = vadd.f32 %v510_v44, %v501_v40  ;;  %v502_v49 = vadd.f32 %v498_v35, %v488_v47  ;;  %v626_v35 = vstv %s2469_s25  ;;  %s2562_s25 = sld [smem:[#allocation7 + $0x4a]] }
 0x185   : > { %943 = vrot.lane.b32.xlu1 %v938_v36, %s1972_s28  ;;  %955 = vrot.lane.b32.xlu0 %v951_v39, %s1973_s4  ;;  %v1044_v39 = vmul.f32 %v1042_v24, %v2456_v8  ;;  %v627_v47 = vmul.f32 %v626_v35, %v2254_v60 }
 0x187   : > { %v512_v46 = vpop.permute.xlu1 %511  ;;  %v524_v50 = vpop.permute.xlu0 %523 }
 0x188   : > { %v529_v53 = vadd.f32 %v524_v50, %v515_v45  ;;  %v516_v55 = vadd.f32 %v512_v46, %v502_v49  ;;  %v1070_v46 = vstv %s2476_s20  ;;  %s2569_s20 = sld [smem:[#allocation7 + $0x4b]] }
 0x189   : > { %957 = vrot.lane.b32.xlu1 %v952_v48, %s1973_s4  ;;  %969 = vrot.lane.b32.xlu0 %v965_v51, %s1974_s6  ;;  %v1058_v51 = vmul.f32 %v1056_v34, %v2456_v8  ;;  %v1071_v60 = vmul.f32 %v1070_v46, %v2448_v2 }
 0x18a   : > { %v537_v56 = vadd.f32 %v535_v52, %v529_v53  ;;  %v628_v52 = vmul.f32 %v626_v35, %v2259_v0 }
 0x18b   : > { %v526_v57 = vpop.permute.xlu1 %525  ;;  %v546_v63 = vpop.permute.xlu0 %545 }
 0x18c   : > { %v530_v61 = vadd.f32 %v526_v57, %v516_v55  ;;  %v551_v14 = vadd.f32 %v546_v63, %v537_v56  ;;  %v2499_v55 = vld [vmem:[#allocation2 + $0x1a] sm:$0xff]  ;;  %v1092_v56 = vstv %s2483_s23  ;;  %v2507_v63 = vld [vmem:[#allocation2 + $0x22] sm:$0xff]  ;;  %s2571_s23 = sld [smem:[#allocation7 + $0x2a]] }
 0x18d   : > { %971 = vrot.lane.b32.xlu1 %v966_v58, %s1974_s6  ;;  %983 = vrot.lane.b32.xlu0 %v979_v38, %s1975_s19  ;;  %v1106_v38 = vstv %s2492_s29  ;;  %v1135_v24 = vmul.f32 %v1134_v21, %v2499_v55  ;;  %s2578_s29 = sld [smem:[#allocation7 + $0x4c]] }
 0x18e   : > { %v538_v4 = vadd.f32 %v536_v59, %v530_v61  ;;  %v1072_v59 = vmul.f32 %v1070_v46, %v2456_v8  ;;  %v1093_v61 = vmul.f32 %v1092_v56, %v2499_v55 }
 0x18f   : > { %v548_v5 = vpop.permute.xlu1 %547  ;;  %v560_v41 = vpop.permute.xlu0 %559 }
 0x190   : > { %v565_v23 = vadd.f32 %v560_v41, %v551_v14  ;;  %v552_v25 = vadd.f32 %v548_v5, %v538_v4  ;;  %v1094_v4 = vmul.f32 %v1092_v56, %v2507_v63  ;;  %v1120_v41 = vstv %s2502_s7  ;;  %s2585_s7 = sld [smem:[#allocation7 + $0x4e]] }
 0x191   : > { %985 = vrot.lane.b32.xlu1 %v980_v6, %s1975_s19  ;;  %1005 = vrot.lane.b32.xlu0 %v1001_v7, %s1970_s16  ;;  %v1107_v6 = vmul.f32 %v1106_v38, %v2499_v55 }
 0x193   : > { %v562_v10 = vpop.permute.xlu1 %561  ;;  %v574_v12 = vpop.permute.xlu0 %573 }
 0x194   : > { %v579_v27 = vadd.f32 %v574_v12, %v565_v23  ;;  %v566_v30 = vadd.f32 %v562_v10, %v552_v25  ;;  %v1108_v10 = vmul.f32 %v1106_v38, %v2507_v63  ;;  %v1121_v12 = vmul.f32 %v1120_v41, %v2499_v55 }
 0x195   : > { %1007 = vrot.lane.b32.xlu1 %v1002_v11, %s1970_s16  ;;  %1019 = vrot.lane.b32.xlu0 %v1015_v13, %s1971_s27 }
 0x197   : > { %v576_v62 = vpop.permute.xlu1 %575  ;;  %v588_v19 = vpop.permute.xlu0 %587 }
 0x198   : > { %v593_v33 = vadd.f32 %v588_v19, %v579_v27  ;;  %v580_v36 = vadd.f32 %v576_v62, %v566_v30  ;;  %v1122_v19 = vmul.f32 %v1120_v41, %v2507_v63  ;;  %v1148_v27 = vstv %s2518_s26  ;;  %s2604_s26 = sld [smem:[#allocation7 + $0x50]] }
 0x199   : > { %1021 = vrot.lane.b32.xlu1 %v1016_v17, %s1971_s27  ;;  %1033 = vrot.lane.b32.xlu0 %v1029_v22, %s1972_s28  ;;  %v1149_v35 = vmul.f32 %v1148_v27, %v2499_v55  ;;  %v1226_v41 = vstv %s2562_s25  ;;  %s2645_s25 = sld [smem:[#allocation7 + $0x56]] }
 0x19b   : > { %v590_v28 = vpop.permute.xlu1 %589  ;;  %v602_v31 = vpop.permute.xlu0 %601 }
 0x19c   : > { %v607_v37 = vadd.f32 %v602_v31, %v593_v33  ;;  %v594_v40 = vadd.f32 %v590_v28, %v580_v36  ;;  %v718_v28 = vstv %s2520_s30  ;;  %s2613_s30 = sld [smem:[#allocation7 + $0x51]] }
 0x19d   : > { %1035 = vrot.lane.b32.xlu1 %v1030_v29, %s1972_s28  ;;  %1047 = vrot.lane.b32.xlu0 %v1043_v32, %s1973_s4  ;;  %v1136_v32 = vmul.f32 %v1134_v21, %v2507_v63  ;;  %v719_v36 = vmul.f32 %v718_v28, %v2290_v20 }
 0x19f   : > { %v604_v44 = vpop.permute.xlu1 %603  ;;  %v616_v42 = vpop.permute.xlu0 %615 }
 0x1a0   : > { %v621_v45 = vadd.f32 %v616_v42, %v607_v37  ;;  %v608_v48 = vadd.f32 %v604_v44, %v594_v40  ;;  %v1162_v44 = vstv %s2527_s3  ;;  %s2620_s3 = sld [smem:[#allocation7 + $0x52]] }
 0x1a1   : > { %1049 = vrot.lane.b32.xlu1 %v1044_v39, %s1973_s4  ;;  %1061 = vrot.lane.b32.xlu0 %v1057_v43, %s1974_s6  ;;  %v1150_v43 = vmul.f32 %v1148_v27, %v2507_v63  ;;  %v1163_v20 = vmul.f32 %v1162_v44, %v2499_v55 }
 0x1a2   : > { %v629_v49 = vadd.f32 %v627_v47, %v621_v45  ;;  %v720_v47 = vmul.f32 %v718_v28, %v2299_v26 }
 0x1a3   : > { %v618_v50 = vpop.permute.xlu1 %617  ;;  %v638_v54 = vpop.permute.xlu0 %637 }
 0x1a4   : > { %v622_v53 = vadd.f32 %v618_v50, %v608_v48  ;;  %v643_v7 = vadd.f32 %v638_v54, %v629_v49  ;;  %v2550_v48 = vld [vmem:[#allocation2 + $0x1b] sm:$0xff]  ;;  %v1184_v49 = vstv %s2534_s5  ;;  %v2558_v54 = vld [vmem:[#allocation2 + $0x23] sm:$0xff]  ;;  %s2623_s5 = sld [smem:[#allocation7 + $0x31]] }
 0x1a5   : > { %1063 = vrot.lane.b32.xlu1 %v1058_v51, %s1974_s6  ;;  %1075 = vrot.lane.b32.xlu0 %v1071_v60, %s1975_s19  ;;  %v1198_v60 = vstv %s2543_s8  ;;  %v1227_v21 = vmul.f32 %v1226_v41, %v2550_v48  ;;  %s2629_s8 = sld [smem:[#allocation7 + $0x53]] }
 0x1a6   : > { %v630_v57 = vadd.f32 %v628_v52, %v622_v53  ;;  %v1164_v52 = vmul.f32 %v1162_v44, %v2507_v63  ;;  %v1185_v53 = vmul.f32 %v1184_v49, %v2550_v48 }
 0x1a7   : > { %v640_v58 = vpop.permute.xlu1 %639  ;;  %v652_v0 = vpop.permute.xlu0 %651 }
 0x1a8   : > { %v657_v13 = vadd.f32 %v652_v0, %v643_v7  ;;  %v644_v14 = vadd.f32 %v640_v58, %v630_v57  ;;  %v1186_v57 = vmul.f32 %v1184_v49, %v2558_v54  ;;  %v1212_v0 = vstv %s2553_s24  ;;  %v2609_v49 = vld [vmem:[#allocation2 + $0x24] sm:$0xff]  ;;  %s2636_s24 = sld [smem:[#allocation7 + $0x55]] }
 0x1a9   : > { %1077 = vrot.lane.b32.xlu1 %v1072_v59, %s1975_s19  ;;  %1097 = vrot.lane.b32.xlu0 %v1093_v61, %s1970_s16  ;;  %v1199_v59 = vmul.f32 %v1198_v60, %v2550_v48 }
 0x1ab   : > { %v654_v3 = vpop.permute.xlu1 %653  ;;  %v666_v5 = vpop.permute.xlu0 %665 }
 0x1ac   : > { %v671_v62 = vadd.f32 %v666_v5, %v657_v13  ;;  %v658_v22 = vadd.f32 %v654_v3, %v644_v14  ;;  %v1200_v3 = vmul.f32 %v1198_v60, %v2558_v54  ;;  %v1213_v5 = vmul.f32 %v1212_v0, %v2550_v48 }
 0x1ad   : > { %1099 = vrot.lane.b32.xlu1 %v1094_v4, %s1970_s16  ;;  %1111 = vrot.lane.b32.xlu0 %v1107_v6, %s1971_s27 }
 0x1af   : > { %v668_v18 = vpop.permute.xlu1 %667  ;;  %v680_v11 = vpop.permute.xlu0 %679 }
 0x1b0   : > { %v685_v25 = vadd.f32 %v680_v11, %v671_v62  ;;  %v672_v29 = vadd.f32 %v668_v18, %v658_v22  ;;  %v1214_v11 = vmul.f32 %v1212_v0, %v2558_v54  ;;  %v1240_v62 = vstv %s2569_s20  ;;  %s2655_s20 = sld [smem:[#allocation7 + $0x57]] }
 0x1b1   : > { %1113 = vrot.lane.b32.xlu1 %v1108_v10, %s1971_s27  ;;  %1125 = vrot.lane.b32.xlu0 %v1121_v12, %s1972_s28  ;;  %v1241_v28 = vmul.f32 %v1240_v62, %v2550_v48 }
 0x1b3   : > { %v682_v17 = vpop.permute.xlu1 %681  ;;  %v694_v23 = vpop.permute.xlu0 %693 }
 0x1b4   : > { %v699_v30 = vadd.f32 %v694_v23, %v685_v25  ;;  %v686_v33 = vadd.f32 %v682_v17, %v672_v29  ;;  %v810_v17 = vstv %s2571_s23  ;;  %s2664_s23 = sld [smem:[#allocation7 + $0x58]] }
 0x1b5   : > { %1127 = vrot.lane.b32.xlu1 %v1122_v19, %s1972_s28  ;;  %1139 = vrot.lane.b32.xlu0 %v1135_v24, %s1973_s4  ;;  %v1228_v24 = vmul.f32 %v1226_v41, %v2558_v54  ;;  %v811_v29 = vmul.f32 %v810_v17, %v2345_v16 }
 0x1b7   : > { %v696_v31 = vpop.permute.xlu1 %695  ;;  %v708_v34 = vpop.permute.xlu0 %707 }
 0x1b8   : > { %v713_v37 = vadd.f32 %v708_v34, %v699_v30  ;;  %v700_v39 = vadd.f32 %v696_v31, %v686_v33  ;;  %v1254_v31 = vstv %s2578_s29  ;;  %s2671_s29 = sld [smem:[#allocation7 + $0x59]] }
 0x1b9   : > { %1141 = vrot.lane.b32.xlu1 %v1136_v32, %s1973_s4  ;;  %1153 = vrot.lane.b32.xlu0 %v1149_v35, %s1974_s6  ;;  %v1242_v35 = vmul.f32 %v1240_v62, %v2558_v54  ;;  %v1255_v16 = vmul.f32 %v1254_v31, %v2550_v48 }
 0x1ba   : > { %v721_v40 = vadd.f32 %v719_v36, %v713_v37  ;;  %v812_v36 = vmul.f32 %v810_v17, %v2353_v1 }
 0x1bb   : > { %v710_v42 = vpop.permute.xlu1 %709  ;;  %v730_v46 = vpop.permute.xlu0 %729 }
 0x1bc   : > { %v714_v45 = vadd.f32 %v710_v42, %v700_v39  ;;  %v735_v61 = vadd.f32 %v730_v46, %v721_v40  ;;  %v2601_v40 = vld [vmem:[#allocation2 + $0x1c] sm:$0xff]  ;;  %v1276_v42 = vstv %s2585_s7  ;;  %s2674_s7 = sld [smem:[#allocation7 + $0x38]] }
 0x1bd   : > { %1155 = vrot.lane.b32.xlu1 %v1150_v43, %s1974_s6  ;;  %1167 = vrot.lane.b32.xlu0 %v1163_v20, %s1975_s19  ;;  %v1277_v20 = vmul.f32 %v1276_v42, %v2601_v40 }
 0x1be   : > { %v722_v50 = vadd.f32 %v720_v47, %v714_v45  ;;  %v1256_v45 = vmul.f32 %v1254_v31, %v2558_v54 }
 0x1bf   : > { %v732_v51 = vpop.permute.xlu1 %731  ;;  %v744_v26 = vpop.permute.xlu0 %743 }
 0x1c0   : > { %v749_v6 = vadd.f32 %v744_v26, %v735_v61  ;;  %v736_v7 = vadd.f32 %v732_v51, %v722_v50  ;;  %v1290_v51 = vstv %s2594_s17  ;;  %v1278_v26 = vmul.f32 %v1276_v42, %v2609_v49  ;;  %s2680_s17 = sld [smem:[#allocation7 + $0x5a]] }
 0x1c1   : > { %1169 = vrot.lane.b32.xlu1 %v1164_v52, %s1975_s19  ;;  %1189 = vrot.lane.b32.xlu0 %v1185_v53, %s1970_s16  ;;  %v1292_v0 = vmul.f32 %v1290_v51, %v2609_v49 }
 0x1c3   : > { %v746_v56 = vpop.permute.xlu1 %745  ;;  %v758_v58 = vpop.permute.xlu0 %757 }
 0x1c4   : > { %v763_v18 = vadd.f32 %v758_v58, %v749_v6  ;;  %v750_v12 = vadd.f32 %v746_v56, %v736_v7  ;;  %v1291_v56 = vmul.f32 %v1290_v51, %v2601_v40  ;;  %v1304_v58 = vstv %s2604_s26  ;;  %s2687_s26 = sld [smem:[#allocation7 + $0x5c]] }
 0x1c5   : > { %1191 = vrot.lane.b32.xlu1 %v1186_v57, %s1970_s16  ;;  %1203 = vrot.lane.b32.xlu0 %v1199_v59, %s1971_s27  ;;  %v1306_v41 = vmul.f32 %v1304_v58, %v2609_v49  ;;  %v1396_v51 = vstv %s2655_s20 }
 0x1c7   : > { %v760_v38 = vpop.permute.xlu1 %759  ;;  %v772_v4 = vpop.permute.xlu0 %771 }
 0x1c8   : > { %v777_v14 = vadd.f32 %v772_v4, %v763_v18  ;;  %v764_v19 = vadd.f32 %v760_v38, %v750_v12  ;;  %v1332_v12 = vstv %s2620_s3  ;;  %s2706_s3 = sld [smem:[#allocation7 + $0x5e]] }
 0x1c9   : > { %1205 = vrot.lane.b32.xlu1 %v1200_v3, %s1971_s27  ;;  %1217 = vrot.lane.b32.xlu0 %v1213_v5, %s1972_s28  ;;  %v1305_v3 = vmul.f32 %v1304_v58, %v2601_v40  ;;  %v1318_v5 = vstv %s2613_s30  ;;  %v1410_v58 = vstv %s2664_s23  ;;  %s2696_s30 = sld [smem:[#allocation7 + $0x5d]] }
 0x1cb   : > { %v774_v10 = vpop.permute.xlu1 %773  ;;  %v786_v13 = vpop.permute.xlu0 %785 }
 0x1cc   : > { %v791_v22 = vadd.f32 %v786_v13, %v777_v14  ;;  %v778_v25 = vadd.f32 %v774_v10, %v764_v19  ;;  %v1319_v10 = vmul.f32 %v1318_v5, %v2601_v40  ;;  %v902_v13 = vstv %s2623_s5  ;;  %s2715_s5 = sld [smem:[#allocation7 + $0x5f]] }
 0x1cd   : > { %1219 = vrot.lane.b32.xlu1 %v1214_v11, %s1972_s28  ;;  %1231 = vrot.lane.b32.xlu0 %v1227_v21, %s1973_s4  ;;  %v1320_v14 = vmul.f32 %v1318_v5, %v2609_v49  ;;  %v1333_v19 = vmul.f32 %v1332_v12, %v2601_v40  ;;  %v994_v5 = vstv %s2674_s7 }
 0x1cf   : > { %v788_v23 = vpop.permute.xlu1 %787  ;;  %v800_v27 = vpop.permute.xlu0 %799 }
 0x1d0   : > { %v805_v30 = vadd.f32 %v800_v27, %v791_v22  ;;  %v792_v32 = vadd.f32 %v788_v23, %v778_v25  ;;  %v903_v22 = vmul.f32 %v902_v13, %v2397_v9 }
 0x1d1   : > { %1233 = vrot.lane.b32.xlu1 %v1228_v24, %s1973_s4  ;;  %1245 = vrot.lane.b32.xlu0 %v1241_v28, %s1974_s6  ;;  %v1346_v24 = vstv %s2629_s8  ;;  %v1334_v28 = vmul.f32 %v1332_v12, %v2609_v49  ;;  %s2722_s8 = sld [smem:[#allocation7 + $0x60]] }
 0x1d2   : > { %v813_v33 = vadd.f32 %v811_v29, %v805_v30  ;;  %v904_v29 = vmul.f32 %v902_v13, %v2405_v15  ;;  %v1438_v13 = vstv %s2680_s17 }
 0x1d3   : > { %v802_v34 = vpop.permute.xlu1 %801  ;;  %v822_v44 = vpop.permute.xlu0 %821 }
 0x1d4   : > { %v806_v37 = vadd.f32 %v802_v34, %v792_v32  ;;  %v827_v39 = vadd.f32 %v822_v44, %v813_v33  ;;  %v1347_v32 = vmul.f32 %v1346_v24, %v2601_v40  ;;  %v2652_v33 = vld [vmem:[#allocation2 + $0x1d] sm:$0xff]  ;;  %v1368_v34 = vstv %s2636_s24  ;;  %s2725_s24 = sld [smem:[#allocation7 + $0x3f]] }
 0x1d5   : > { %1247 = vrot.lane.b32.xlu1 %v1242_v35, %s1974_s6  ;;  %1259 = vrot.lane.b32.xlu0 %v1255_v16, %s1975_s19  ;;  %v1369_v16 = vmul.f32 %v1368_v34, %v2652_v33 }
 0x1d6   : > { %v814_v43 = vadd.f32 %v812_v36, %v806_v37  ;;  %v1348_v37 = vmul.f32 %v1346_v24, %v2609_v49  ;;  %v2703_v24 = vld [vmem:[#allocation2 + $0x1e] sm:$0xff] }
 0x1d7   : > { %v824_v47 = vpop.permute.xlu1 %823  ;;  %v836_v46 = vpop.permute.xlu0 %835 }
 0x1d8   : > { %v828_v1 = vadd.f32 %v824_v47, %v814_v43  ;;  %v841_v50 = vadd.f32 %v836_v46, %v827_v39  ;;  %v2660_v39 = vld [vmem:[#allocation2 + $0x25] sm:$0xff]  ;;  %v1382_v43 = vstv %s2645_s25  ;;  %s1773_s25 = sshll.u32 %s2015_s13, 8 }
 0x1d9   : > { %1261 = vrot.lane.b32.xlu1 %v1256_v45, %s1975_s19  ;;  %1281 = vrot.lane.b32.xlu0 %v1277_v20, %s1970_s16  ;;  %v1370_v45 = vmul.f32 %v1368_v34, %v2660_v39  ;;  %v1383_v20 = vmul.f32 %v1382_v43, %v2652_v33  ;;  %s2767_s17 = scalar_lea.hbm %s2815_s2, %s1773_s25 }
 0x1db   : > { %v838_v52 = vpop.permute.xlu1 %837  ;;  %v850_v60 = vpop.permute.xlu0 %849 }
 0x1dc   : > { %v842_v53 = vadd.f32 %v838_v52, %v828_v1  ;;  %v855_v57 = vadd.f32 %v850_v60, %v841_v50 }
 0x1dd   : > { %1283 = vrot.lane.b32.xlu1 %v1278_v26, %s1970_s16  ;;  %1295 = vrot.lane.b32.xlu0 %v1291_v56, %s1971_s27  ;;  %v1384_v26 = vmul.f32 %v1382_v43, %v2660_v39  ;;  %v1397_v56 = vmul.f32 %v1396_v51, %v2652_v33 }
 0x1df   : > { %v852_v59 = vpop.permute.xlu1 %851  ;;  %v864_v38 = vpop.permute.xlu0 %863 }
 0x1e0   : > { %v856_v61 = vadd.f32 %v852_v59, %v842_v53  ;;  %v869_v4 = vadd.f32 %v864_v38, %v855_v57 }
 0x1e1   : > { %1297 = vrot.lane.b32.xlu1 %v1292_v0, %s1971_s27  ;;  %1309 = vrot.lane.b32.xlu0 %v1305_v3, %s1972_s28  ;;  %v1398_v0 = vmul.f32 %v1396_v51, %v2660_v39  ;;  %v1411_v3 = vmul.f32 %v1410_v58, %v2652_v33 }
 0x1e3   : > { %v866_v6 = vpop.permute.xlu1 %865  ;;  %v878_v18 = vpop.permute.xlu0 %877 }
 0x1e4   : > { %v870_v7 = vadd.f32 %v866_v6, %v856_v61  ;;  %v883_v11 = vadd.f32 %v878_v18, %v869_v4  ;;  %v1424_v4 = vstv %s2671_s29 }
 0x1e5   : > { %1311 = vrot.lane.b32.xlu1 %v1306_v41, %s1972_s28  ;;  %1323 = vrot.lane.b32.xlu0 %v1319_v10, %s1973_s4  ;;  %v1425_v10 = vmul.f32 %v1424_v4, %v2652_v33 }
 0x1e7   : > { %v880_v21 = vpop.permute.xlu1 %879  ;;  %v892_v17 = vpop.permute.xlu0 %891 }
 0x1e8   : > { %v884_v62 = vadd.f32 %v880_v21, %v870_v7  ;;  %v897_v23 = vadd.f32 %v892_v17, %v883_v11  ;;  %v1412_v7 = vmul.f32 %v1410_v58, %v2660_v39  ;;  %v995_v11 = vmul.f32 %v994_v5, %v2448_v2 }
 0x1e9   : > { %1325 = vrot.lane.b32.xlu1 %v1320_v14, %s1973_s4  ;;  %1337 = vrot.lane.b32.xlu0 %v1333_v19, %s1974_s6  ;;  %v1426_v17 = vmul.f32 %v1424_v4, %v2660_v39  ;;  %v996_v19 = vmul.f32 %v994_v5, %v2456_v8  ;;  %v1439_v2 = vmul.f32 %v1438_v13, %v2652_v33 }
 0x1ea   : > { %v905_v25 = vadd.f32 %v903_v22, %v897_v23 }
 0x1eb   : > { %v894_v27 = vpop.permute.xlu1 %893  ;;  %v914_v31 = vpop.permute.xlu0 %913 }
 0x1ec   : > { %v898_v30 = vadd.f32 %v894_v27, %v884_v62  ;;  %v919_v9 = vadd.f32 %v914_v31, %v905_v25  ;;  %v1460_v25 = vstv %s2687_s26  ;;  %v2711_v31 = vld [vmem:[#allocation2 + $0x26] sm:$0xff]  ;;  %s1558_s26 = scalar_lea.sflag [#allocation5], %s2114_s14 }
 0x1ed   : > { %1339 = vrot.lane.b32.xlu1 %v1334_v28, %s1974_s6  ;;  %1351 = vrot.lane.b32.xlu0 %v1347_v32, %s1975_s19  ;;  %v1474_v32 = vstv %s2696_s30  ;;  %v1462_v34 = vmul.f32 %v1460_v25, %v2711_v31  ;;  %s1976_s30 = smov [#allocation8]  }
 0x1ee   : > { %v906_v35 = vadd.f32 %v904_v29, %v898_v30  ;;  %v1440_v29 = vmul.f32 %v1438_v13, %v2660_v39  ;;  %v1461_v30 = vmul.f32 %v1460_v25, %v2703_v24 }
 0x1ef   : > { %v916_v36 = vpop.permute.xlu1 %915  ;;  %v928_v44 = vpop.permute.xlu0 %927 }
 0x1f0   : > { %v920_v15 = vadd.f32 %v916_v36, %v906_v35  ;;  %v933_v42 = vadd.f32 %v928_v44, %v919_v9  ;;  %v1475_v36 = vmul.f32 %v1474_v32, %v2703_v24 }
 0x1f1   : > { %1353 = vrot.lane.b32.xlu1 %v1348_v37, %s1975_s19  ;;  %1373 = vrot.lane.b32.xlu0 %v1369_v16, %s1970_s16  ;;  %v1488_v37 = vstv %s2706_s3  ;;  %v1476_v16 = vmul.f32 %v1474_v32, %v2711_v31  ;;  %s1898_s3 = sshll.u32 %s1976_s30, 4  ;;  %s1899_s3 = int_to_ptr.vmem [resolvable:$false] %s1898_s3 }
 0x1f2   : > { %v1489_v43 = vmul.f32 %v1488_v37, %v2703_v24 }
 0x1f3   : > { %v930_v47 = vpop.permute.xlu1 %929  ;;  %v942_v46 = vpop.permute.xlu0 %941 }
 0x1f4   : > { %v934_v1 = vadd.f32 %v930_v47, %v920_v15  ;;  %v947_v50 = vadd.f32 %v942_v46, %v933_v42 }
 0x1f5   : > { %1375 = vrot.lane.b32.xlu1 %v1370_v45, %s1970_s16  ;;  %1387 = vrot.lane.b32.xlu0 %v1383_v20, %s1971_s27  ;;  %v1502_v45 = vstv %s2715_s5  ;;  %s1900_s5 = scalar_lea.vmem %s1899_s3, 512 }
 0x1f7   : > { %v944_v52 = vpop.permute.xlu1 %943  ;;  %v956_v60 = vpop.permute.xlu0 %955 }
 0x1f8   : > { %v948_v53 = vadd.f32 %v944_v52, %v934_v1  ;;  %v961_v57 = vadd.f32 %v956_v60, %v947_v50  ;;  %v1490_v50 = vmul.f32 %v1488_v37, %v2711_v31  ;;  %v1516_v60 = vstv %s2722_s8 }
 0x1f9   : > { %1389 = vrot.lane.b32.xlu1 %v1384_v26, %s1971_s27  ;;  %1401 = vrot.lane.b32.xlu0 %v1397_v56, %s1972_s28  ;;  %v1503_v26 = vmul.f32 %v1502_v45, %v2703_v24 }
 0x1fb   : > { %v958_v59 = vpop.permute.xlu1 %957  ;;  %v970_v38 = vpop.permute.xlu0 %969 }
 0x1fc   : > { %v962_v61 = vadd.f32 %v958_v59, %v948_v53  ;;  %v975_v6 = vadd.f32 %v970_v38, %v961_v57  ;;  %v1086_v57 = vstv %s2725_s24 }
 0x1fd   : > { %1403 = vrot.lane.b32.xlu1 %v1398_v0, %s1972_s28  ;;  %1415 = vrot.lane.b32.xlu0 %v1411_v3, %s1973_s4  ;;  %v1504_v0 = vmul.f32 %v1502_v45, %v2711_v31  ;;  %v1517_v3 = vmul.f32 %v1516_v60, %v2703_v24  ;;  %v1087_v4 = vmul.f32 %v1086_v57, %v2499_v55 }
 0x1ff   : > { %v972_v41 = vpop.permute.xlu1 %971  ;;  %v984_v18 = vpop.permute.xlu0 %983 }
 0x200   : > { %v989_v12 = vadd.f32 %v984_v18, %v975_v6  ;;  %v976_v21 = vadd.f32 %v972_v41, %v962_v61 }
 0x201   : > { %1417 = vrot.lane.b32.xlu1 %v1412_v7, %s1973_s4  ;;  %1429 = vrot.lane.b32.xlu0 %v1425_v10, %s1974_s6  ;;  %v1518_v10 = vmul.f32 %v1516_v60, %v2711_v31 }
 0x202   : > { %v997_v14 = vadd.f32 %v995_v11, %v989_v12  ;;  %v1088_v11 = vmul.f32 %v1086_v57, %v2507_v63 }
 0x203   : > { %v986_v62 = vpop.permute.xlu1 %985  ;;  %v1006_v23 = vpop.permute.xlu0 %1005 }
 0x204   : > { %v990_v22 = vadd.f32 %v986_v62, %v976_v21  ;;  %v1011_v15 = vadd.f32 %v1006_v23, %v997_v14 }
 0x205   : > { %1431 = vrot.lane.b32.xlu1 %v1426_v17, %s1974_s6  ;;  %1443 = vrot.lane.b32.xlu0 %v1439_v2, %s1975_s19 }
 0x206   : > { %v998_v27 = vadd.f32 %v996_v19, %v990_v22 }
 0x207   : > { %v1008_v28 = vpop.permute.xlu1 %1007  ;;  %v1020_v8 = vpop.permute.xlu0 %1019 }
 0x208   : > { %v1025_v47 = vadd.f32 %v1020_v8, %v1011_v15  ;;  %v1012_v1 = vadd.f32 %v1008_v28, %v998_v27 }
 0x209   : > { %1445 = vrot.lane.b32.xlu1 %v1440_v29, %s1975_s19  ;;  %1465 = vrot.lane.b32.xlu0 %v1461_v30, %s1970_s16 }
 0x20b   : > { %v1022_v9 = vpop.permute.xlu1 %1021  ;;  %v1034_v35 = vpop.permute.xlu0 %1033 }
 0x20c   : > { %v1039_v46 = vadd.f32 %v1034_v35, %v1025_v47  ;;  %v1026_v51 = vadd.f32 %v1022_v9, %v1012_v1 }
 0x20d   : > { %1467 = vrot.lane.b32.xlu1 %v1462_v34, %s1970_s16  ;;  %1479 = vrot.lane.b32.xlu0 %v1475_v36, %s1971_s27  ;;  %s2731_s16 = sld [smem:[#allocation7 + $0x61]] }
 0x20f   : > { %v1036_v44 = vpop.permute.xlu1 %1035  ;;  %v1048_v42 = vpop.permute.xlu0 %1047 }
 0x210   : > { %v1053_v53 = vadd.f32 %v1048_v42, %v1039_v46  ;;  %v1040_v56 = vadd.f32 %v1036_v44, %v1026_v51 }
 0x211   : > { %1481 = vrot.lane.b32.xlu1 %v1476_v16, %s1971_s27  ;;  %1493 = vrot.lane.b32.xlu0 %v1489_v43, %s1972_s28  ;;  %s1737_s27 = sld [smem:[#allocation7 + $0x46]] }
 0x213   : > { %v1050_v20 = vpop.permute.xlu1 %1049  ;;  %v1062_v52 = vpop.permute.xlu0 %1061  ;;  %v1530_v6 = vstv %s2731_s16 }
 0x214   : > { %v1067_v58 = vadd.f32 %v1062_v52, %v1053_v53  ;;  %v1054_v61 = vadd.f32 %v1050_v20, %v1040_v56  ;;  %v1531_v21 = vmul.f32 %v1530_v6, %v2703_v24  ;;  %v1532_v62 = vmul.f32 %v1530_v6, %v2711_v31 }
 0x215   : > { %1495 = vrot.lane.b32.xlu1 %v1490_v50, %s1972_s28  ;;  %1507 = vrot.lane.b32.xlu0 %v1503_v26, %s1973_s4  ;;  %s1744_s28 = sld [smem:[#allocation7 + $0x4d]] }
 0x217   : > { %v1064_v59 = vpop.permute.xlu1 %1063  ;;  %v1076_v38 = vpop.permute.xlu0 %1075  ;;  %v1178_v34 = vstv %s1737_s27 }
 0x218   : > { %v1081_v5 = vadd.f32 %v1076_v38, %v1067_v58  ;;  %v1068_v41 = vadd.f32 %v1064_v59, %v1054_v61  ;;  %v1179_v16 = vmul.f32 %v1178_v34, %v2550_v48  ;;  %v1180_v46 = vmul.f32 %v1178_v34, %v2558_v54 }
 0x219   : > { %1509 = vrot.lane.b32.xlu1 %v1504_v0, %s1973_s4  ;;  %1521 = vrot.lane.b32.xlu0 %v1517_v3, %s1974_s6  ;;  %s1751_s4 = sld [smem:[#allocation7 + $0x54]] }
 0x21a   : > { %v1089_v7 = vadd.f32 %v1087_v4, %v1081_v5 }
 0x21b   : > { %v1078_v18 = vpop.permute.xlu1 %1077  ;;  %v1098_v13 = vpop.permute.xlu0 %1097  ;;  %v1270_v4 = vstv %s1744_s28 }
 0x21c   : > { %v1082_v12 = vadd.f32 %v1078_v18, %v1068_v41  ;;  %v1103_v23 = vadd.f32 %v1098_v13, %v1089_v7  ;;  %v1271_v18 = vmul.f32 %v1270_v4, %v2601_v40 }
 0x21d   : > { %1523 = vrot.lane.b32.xlu1 %v1518_v10, %s1974_s6  ;;  %1535 = vrot.lane.b32.xlu0 %v1531_v21, %s1975_s19  ;;  %s1758_s6 = sld [smem:[#allocation7 + $0x5b]] }
 0x21e   : > { %v1090_v55 = vadd.f32 %v1088_v11, %v1082_v12 }
 0x21f   : > { %v1100_v14 = vpop.permute.xlu1 %1099  ;;  %v1112_v17 = vpop.permute.xlu0 %1111 }
 0x220   : > { %v1117_v25 = vadd.f32 %v1112_v17, %v1103_v23  ;;  %v1104_v27 = vadd.f32 %v1100_v14, %v1090_v55  ;;  %v1272_v55 = vmul.f32 %v1270_v4, %v2609_v49 }
 0x221   : > { %1537 = vrot.lane.b32.xlu1 %v1532_v62, %s1975_s19  ;;  %s1666_s19 = sshll.u32 %s2114_s14, 4 }
 0x222   : > { %s175_s20 = scalar_lea.vmem [#allocation8], %s1666_s19 }
 0x223   : > { %v1114_v19 = vpop.permute.xlu1 %1113  ;;  %v1126_v22 = vpop.permute.xlu0 %1125  ;;  %s1571_s23 = sshll.u32 %s175_s20, 4  ;;  %s2769_s23 = int_to_ptr.vmem [resolvable:$true] %s1571_s23 }
 0x224   : > { %v1131_v28 = vadd.f32 %v1126_v22, %v1117_v25  ;;  %v1118_v8 = vadd.f32 %v1114_v19, %v1104_v27  ;;  %s1894_s13 = scalar_lea.vmem %s2769_s23, 256  ;;  %p1901_p8 = scmp.lt.s32.totalorder %s2769_s23, %s1899_s3 }
 0x225   : > { %p1895_p12 = scmp.ne.s32.totalorder %s2769_s23, %s1894_s13  ;;  %p1902_p9 = scmp.lt.s32.totalorder %s1900_s5, %s1894_s13 }
 0x227   : > { %v1128_v63 = vpop.permute.xlu1 %1127  ;;  %v1140_v2 = vpop.permute.xlu0 %1139  ;;  %p1896_p2 = pnand %p1895_p12, %p2831_p0  ;;  %p1903_p10 = por %p1902_p9, %p1901_p8 }
 0x228   : > { %v1145_v32 = vadd.f32 %v1140_v2, %v1131_v28  ;;  %v1132_v9 = vadd.f32 %v1128_v63, %v1118_v8 }
 0x229   : > { %p1897_p7 = pneg %p1896_p2 }
 0x22b   : > { %v1142_v29 = vpop.permute.xlu1 %1141  ;;  %v1154_v30 = vpop.permute.xlu0 %1153  ;;  %p1904_p1 = pnand %p1903_p10, %p1897_p7 }
 0x22c   : > { %v1159_v35 = vadd.f32 %v1154_v30, %v1145_v32  ;;  %v1146_v37 = vadd.f32 %v1142_v29, %v1132_v9  ;;  %v1362_v9 = vstv %s1751_s4 }
 0x22f   : > { %v1156_v36 = vpop.permute.xlu1 %1155  ;;  %v1168_v15 = vpop.permute.xlu0 %1167 }
 0x230   : > { %v1173_v44 = vadd.f32 %v1168_v15, %v1159_v35  ;;  %v1160_v42 = vadd.f32 %v1156_v36, %v1146_v37  ;;  %v1363_v15 = vmul.f32 %v1362_v9, %v2652_v33 }
 0x232   : > { %v1181_v47 = vadd.f32 %v1179_v16, %v1173_v44 }
 0x233   : > { %v1170_v43 = vpop.permute.xlu1 %1169  ;;  %v1190_v1 = vpop.permute.xlu0 %1189 }
 0x234   : > { %v1174_v45 = vadd.f32 %v1170_v43, %v1160_v42  ;;  %v1195_v53 = vadd.f32 %v1190_v1, %v1181_v47 }
 0x236   : > { %v1182_v20 = vadd.f32 %v1180_v46, %v1174_v45  ;;  %v1364_v45 = vmul.f32 %v1362_v9, %v2660_v39 }
 0x237   : > { %v1192_v50 = vpop.permute.xlu1 %1191  ;;  %v1204_v51 = vpop.permute.xlu0 %1203 }
 0x238   : > { %v1209_v57 = vadd.f32 %v1204_v51, %v1195_v53  ;;  %v1196_v58 = vadd.f32 %v1192_v50, %v1182_v20 }
 0x23b   : > { %v1206_v52 = vpop.permute.xlu1 %1205  ;;  %v1218_v26 = vpop.permute.xlu0 %1217 }
 0x23c   : > { %v1223_v59 = vadd.f32 %v1218_v26, %v1209_v57  ;;  %v1210_v0 = vadd.f32 %v1206_v52, %v1196_v58 }
 0x23f   : > { %v1220_v60 = vpop.permute.xlu1 %1219  ;;  %v1232_v56 = vpop.permute.xlu0 %1231 }
 0x240   : > { %v1237_v38 = vadd.f32 %v1232_v56, %v1223_v59  ;;  %v1224_v3 = vadd.f32 %v1220_v60, %v1210_v0 }
 0x243   : > { %v1234_v48 = vpop.permute.xlu1 %1233  ;;  %v1246_v61 = vpop.permute.xlu0 %1245 }
 0x244   : > { %v1251_v5 = vadd.f32 %v1246_v61, %v1237_v38  ;;  %v1238_v6 = vadd.f32 %v1234_v48, %v1224_v3  ;;  %v1454_v61 = vstv %s1758_s6 }
 0x247   : > { %v1248_v54 = vpop.permute.xlu1 %1247  ;;  %v1260_v41 = vpop.permute.xlu0 %1259 }
 0x248   : > { %v1265_v7 = vadd.f32 %v1260_v41, %v1251_v5  ;;  %v1252_v10 = vadd.f32 %v1248_v54, %v1238_v6  ;;  %v1455_v54 = vmul.f32 %v1454_v61, %v2703_v24 }
 0x24a   : > { %v1273_v12 = vadd.f32 %v1271_v18, %v1265_v7 }
 0x24b   : > { %v1262_v11 = vpop.permute.xlu1 %1261  ;;  %v1282_v21 = vpop.permute.xlu0 %1281 }
 0x24c   : > { %v1266_v13 = vadd.f32 %v1262_v11, %v1252_v10  ;;  %v1287_v23 = vadd.f32 %v1282_v21, %v1273_v12  ;;  %v1456_v11 = vmul.f32 %v1454_v61, %v2711_v31 }
 0x24e   : > { %v1274_v14 = vadd.f32 %v1272_v55, %v1266_v13 }
 0x24f   : > { %v1284_v62 = vpop.permute.xlu1 %1283  ;;  %v1296_v17 = vpop.permute.xlu0 %1295 }
 0x250   : > { %v1301_v25 = vadd.f32 %v1296_v17, %v1287_v23  ;;  %v1288_v27 = vadd.f32 %v1284_v62, %v1274_v14 }
 0x253   : > { %v1298_v19 = vpop.permute.xlu1 %1297  ;;  %v1310_v22 = vpop.permute.xlu0 %1309 }
 0x254   : > { %v1315_v28 = vadd.f32 %v1310_v22, %v1301_v25  ;;  %v1302_v29 = vadd.f32 %v1298_v19, %v1288_v27 }
 0x257   : > { %v1312_v63 = vpop.permute.xlu1 %1311  ;;  %v1324_v2 = vpop.permute.xlu0 %1323 }
 0x258   : > { %v1329_v30 = vadd.f32 %v1324_v2, %v1315_v28  ;;  %v1316_v32 = vadd.f32 %v1312_v63, %v1302_v29 }
 0x25b   : > { %v1326_v40 = vpop.permute.xlu1 %1325  ;;  %v1338_v8 = vpop.permute.xlu0 %1337 }
 0x25c   : > { %v1343_v34 = vadd.f32 %v1338_v8, %v1329_v30  ;;  %v1330_v35 = vadd.f32 %v1326_v40, %v1316_v32 }
 0x25f   : > { %v1340_v49 = vpop.permute.xlu1 %1339  ;;  %v1352_v36 = vpop.permute.xlu0 %1351 }
 0x260   : > { %v1357_v37 = vadd.f32 %v1352_v36, %v1343_v34  ;;  %v1344_v44 = vadd.f32 %v1340_v49, %v1330_v35 }
 0x262   : > { %v1365_v42 = vadd.f32 %v1363_v15, %v1357_v37 }
 0x263   : > { %v1354_v16 = vpop.permute.xlu1 %1353  ;;  %v1374_v47 = vpop.permute.xlu0 %1373 }
 0x264   : > { %v1358_v43 = vadd.f32 %v1354_v16, %v1344_v44  ;;  %v1379_v52 = vadd.f32 %v1374_v47, %v1365_v42 }
 0x266   : > { %v1366_v1 = vadd.f32 %v1364_v45, %v1358_v43 }
 0x267   : > { %v1376_v46 = vpop.permute.xlu1 %1375  ;;  %v1388_v20 = vpop.permute.xlu0 %1387 }
 0x268   : > { %v1393_v60 = vadd.f32 %v1388_v20, %v1379_v52  ;;  %v1380_v56 = vadd.f32 %v1376_v46, %v1366_v1 }
 0x26b   : > { %v1390_v50 = vpop.permute.xlu1 %1389  ;;  %v1402_v51 = vpop.permute.xlu0 %1401 }
 0x26c   : > { %v1407_v57 = vadd.f32 %v1402_v51, %v1393_v60  ;;  %v1394_v58 = vadd.f32 %v1390_v50, %v1380_v56 }
 0x26f   : > { %v1404_v26 = vpop.permute.xlu1 %1403  ;;  %v1416_v53 = vpop.permute.xlu0 %1415 }
 0x270   : > { %v1421_v48 = vadd.f32 %v1416_v53, %v1407_v57  ;;  %v1408_v0 = vadd.f32 %v1404_v26, %v1394_v58 }
 0x273   : > { %v1418_v33 = vpop.permute.xlu1 %1417  ;;  %v1430_v59 = vpop.permute.xlu0 %1429 }
 0x274   : > { %v1435_v38 = vadd.f32 %v1430_v59, %v1421_v48  ;;  %v1422_v3 = vadd.f32 %v1418_v33, %v1408_v0 }
 0x277   : > { %v1432_v39 = vpop.permute.xlu1 %1431  ;;  %v1444_v4 = vpop.permute.xlu0 %1443 }
 0x278   : > { %v1449_v5 = vadd.f32 %v1444_v4, %v1435_v38  ;;  %v1436_v6 = vadd.f32 %v1432_v39, %v1422_v3 }
 0x27a   : > { %v1457_v7 = vadd.f32 %v1455_v54, %v1449_v5 }
 0x27b   : > { %v1446_v41 = vpop.permute.xlu1 %1445  ;;  %v1466_v10 = vpop.permute.xlu0 %1465 }
 0x27c   : > { %v1450_v18 = vadd.f32 %v1446_v41, %v1436_v6  ;;  %v1471_v62 = vadd.f32 %v1466_v10, %v1457_v7 }
 0x27e   : > { %v1458_v12 = vadd.f32 %v1456_v11, %v1450_v18 }
 0x27f   : > { %v1468_v13 = vpop.permute.xlu1 %1467  ;;  %v1480_v21 = vpop.permute.xlu0 %1479 }
 0x280   : > { %v1485_v22 = vadd.f32 %v1480_v21, %v1471_v62  ;;  %v1472_v23 = vadd.f32 %v1468_v13, %v1458_v12 }
 0x283   : > { %v1482_v55 = vpop.permute.xlu1 %1481  ;;  %v1494_v14 = vpop.permute.xlu0 %1493 }
 0x284   : > { %v1499_v63 = vadd.f32 %v1494_v14, %v1485_v22  ;;  %v1486_v24 = vadd.f32 %v1482_v55, %v1472_v23 }
 0x287   : > { %v1496_v17 = vpop.permute.xlu1 %1495  ;;  %v1508_v19 = vpop.permute.xlu0 %1507 }
 0x288   : > { %v1513_v27 = vadd.f32 %v1508_v19, %v1499_v63  ;;  %v1500_v28 = vadd.f32 %v1496_v17, %v1486_v24 }
 0x28b   : > { %v1510_v2 = vpop.permute.xlu1 %1509  ;;  %v1522_v25 = vpop.permute.xlu0 %1521 }
 0x28c   : > { %v1527_v40 = vadd.f32 %v1522_v25, %v1513_v27  ;;  %v1514_v8 = vadd.f32 %v1510_v2, %v1500_v28 }
 0x28f   : > { %v1524_v29 = vpop.permute.xlu1 %1523  ;;  %v1536_v31 = vpop.permute.xlu0 %1535 }
 0x290   : > { %v1541_v30 = vadd.f32 %v1536_v31, %v1527_v40  ;;  %v1528_v32 = vadd.f32 %v1524_v29, %v1514_v8 }
 0x292   : > { %v1765_v9 = vmul.f32 -1.442695, %v1541_v30 }
 0x293   : > { %v1538_v34 = vpop.permute.xlu1 %1537 }
 0x294   : > { %v1542_v49 = vadd.f32 %v1538_v34, %v1528_v32  ;;  %1843 = vpow2.f32 %v1765_v9 }
 0x296   : > { %v1766_v35 = vmul.f32 -1.442695, %v1542_v49 }
 0x298   : > { %1845 = vpow2.f32 %v1766_v35 }
 0x2a1   : > { %v1844_v36 = vpop.eup %1843 }
 0x2a2   : > { %v1549_v37 = vadd.f32 1.0, %v1844_v36 }
 0x2a4   : > { %1847 = vrcp.f32 %v1549_v37 }
 0x2a5   : > { %v1846_v15 = vpop.eup %1845 }
 0x2a6   : > { %v1550_v44 = vadd.f32 1.0, %v1846_v15 }
 0x2a8   : > { %1849 = vrcp.f32 %v1550_v44 }
 0x2b1   : > { %v1848_v16 = vpop.eup %1847 }
 0x2b2   : > { %1555 = vst.msk [vmem:[%s175_s20] sm:$0xff] %vm200_vm0, %v1848_v16 }
 0x2b5   : > { %v1850_v42 = vpop.eup %1849 }
 0x2b6   : > { %1556 = vst.msk [vmem:[%s175_s20 + $0x8] sm:$0xff] %vm200_vm0, %v1850_v42 }
 0x2b7   : > { %1907 = shalt.err (!%p1904_p1)
}
 0x2b8   : > { %s1908_s8 = scalar_lea.hbm %s2767_s17, 256  ;;  %s1912_s27 = scalar_lea.hbm %s2815_s2, 512 }
 0x2b9   : > { %p1909_p4 = scmp.ne.s32.totalorder %s2767_s17, %s1908_s8  ;;  %p1913_p6 = scmp.lt.s32.totalorder %s2767_s17, %s2815_s2 }
 0x2ba   : > { %p1914_p13 = scmp.lt.s32.totalorder %s1912_s27, %s1908_s8 }
 0x2bb   : > { %p1910_p11 = pnand %p1909_p4, %p2831_p0 }
 0x2bc   : > { %p1915_p3 = por %p1914_p13, %p1913_p6 }
 0x2bd   : > { %p1911_p5 = pneg %p1910_p11 }
 0x2bf   : > { %p1916_p12 = pnand %p1915_p3, %p1911_p5 }
 0x2c1   : > { %1919 = shalt.err (!%p1916_p12)
}
 0x2c2   : > { %s1977_s6 = smov 128   ;;  %s1978_s19 = smov 8  }
 0x2c3   : > { %1780 = dma.vmem_to_hbm [thread:$0]  (%p2831_p0), %s2769_s23, 256, %s2767_s17, %s1558_s26, %s1977_s6, %s1977_s6, %s1978_s19  }
 0x2c4 PF: > { %s1586_s25 = sand.u32 1, %s1950_s9   ;;  %p2832_p2 = scmp.ne.s32.totalorder %s2823_s22, 0 }
 0x2c5   : > { %p2833_p7 = scmp.ge.s32.totalorder %s1962_s12, 2  ;;  %s1587_s20 = scalar_lea.sflag [#allocation5], %s1586_s25 }
 0x2c7   : > { %p1791_p8 = pnand %p2833_p7, %p2832_p2 }
 0x2c9   : > { %p1792_p9 = pneg %p1791_p8 }
 0x2cb   : > { %1945 = dma.done.wait (%p1792_p9), %s1587_s20, 256  }
 0x2cc   : > { %1947 = vsyncadd (%p1792_p9), %s1587_s20, 4294967040  ;;  %p16_p10 = scmp.ge.s32.totalorder %s2019_s15, 4   ;;  %s2834_s9 = smov %s1954_s10 }
 0x2cd   : > { %s2835_s10 = smov %s1958_s11  ;;  %s2836_s11 = smov %s2031_s18 }
 0x2ce   : > { %s2837_s12 = smov %s2019_s15  ;;  %18 = sbr.rel (!%p16_p10) target bundleno = 6 (0x6), region = 79 }
 0x2d3   :  { %1592 = vsyncpa [#allocation4], 1 }
 0x2d4   :  { %1594 = vsyncpa [#allocation4 + $0x1], 1 }
 0x2d5   :  { %1595 = vsyncpa [#allocation5], 1 }
 0x2d6   :  { %1597 = vsyncpa [#allocation5 + $0x1], 1 }
 0x2d7   :  { %1598 = vsyncpa [#allocation6], 1 }
 0x2d8   :  { %1600 = vsyncpa [#allocation6 + $0x1], 1 }

</bundles_post_ra>
